<compile_context>
chip_gen: v6e
topology: v6e:2x2x1
jax: 0.10.0
libtpu: 0.0.40
codegen_flags: <defaults>
</compile_context>

<pallas_src>
import jax
import jax.numpy as jnp
import numpy as np
from jax import lax
from jax.experimental import pallas as pl
from jax.experimental.pallas import tpu as pltpu

EPS = 1e-5      # nn.BatchNorm2d default eps
KH = KW = 3     # kernel_size=3
LANES = 128


def _round_up(x, m):
    return (x + m - 1) // m * m


def conv_stats_kernel(x_ref, w_ref, conv_ref, stats_ref):
    """Per (batch, H-tile): 3x3 conv via a single im2col matmul + BN partials.

    x_ref:     (Hp, Wp, Cin)   zero-padded input image for this batch element
    w_ref:     (9*Cin, Cpad)   weights, rows ordered (kh, kw, cin), Cout padded
    conv_ref:  (TH, W, Cpad)   f32 conv output tile (lane-dense)
    stats_ref: (8, Cpad)       row 0 = per-channel sum, row 1 = sum of squares
    """
    TH, W, Cpad = conv_ref.shape
    Cin = x_ref.shape[-1]
    h = pl.program_id(1)
    row0 = pl.multiple_of(h * TH, TH)
    xwin = x_ref[pl.ds(row0, TH + 2), :, :]              # (TH+2, Wp, Cin)

    # im2col: 9 shifted (TH, W, Cin) windows concatenated along channels,
    # then ONE MXU dot with K = 9*Cin (instead of 9 tiny dots + 9 acc adds).
    taps = []
    for kh in range(KH):
        xh = xwin[kh:kh + TH]                            # (TH, Wp, Cin)
        for kw in range(KW):
            taps.append(xh[:, kw:kw + W, :])             # (TH, W, Cin)
    patch = jnp.concatenate(taps, axis=-1)               # (TH, W, 9*Cin)
    patch = patch.reshape(TH * W, KH * KW * Cin)

    acc = jnp.dot(patch.astype(jnp.float32), w_ref[...],
                  preferred_element_type=jnp.float32)    # (TH*W, Cpad)
    conv_ref[...] = acc.reshape(TH, W, Cpad)

    # Partial statistics for training-mode BatchNorm; the wrapper combines
    # them across tiles as E[x^2] - mean^2 (single pass over the accumulator).
    s = jnp.sum(acc, axis=0, keepdims=True)              # (1, Cpad)
    ss = jnp.sum(acc * acc, axis=0, keepdims=True)       # (1, Cpad)
    stats_ref[...] = jnp.concatenate(
        [s, ss, jnp.zeros((6, Cpad), jnp.float32)], axis=0)


def bn_relu_kernel(conv_ref, scale_ref, shift_ref, o_ref):
    """y = max(conv * scale + shift, 0) with fused per-channel scale/shift."""
    y = conv_ref[...] * scale_ref[0, :] + shift_ref[0, :]
    o_ref[...] = jnp.maximum(y, 0.0).astype(o_ref.dtype)


def _pick_h_tile(H, W, Cpad, budget_bytes=4 << 20):
    """Largest H-tile that divides H with an f32 tile under budget_bytes
    (kept small so double-buffered tiles fit v7x's 64 MiB VMEM comfortably)."""
    max_rows = max(1, budget_bytes // (W * Cpad * 4))
    th = min(H, max_rows)
    while H % th:
        th -= 1
    return th


def conv_block(x_nchw, w_oihw, b, gamma, beta):
    """ConvBlock forward. x_nchw: [N, Cin, H, W] -> [N, Cout, H, W]."""
    # Conv bias added before training-mode BN is mathematically a no-op
    # (cancelled by mean subtraction, no effect on variance) -> dropped.
    del b
    N, Cin, H, W = x_nchw.shape
    Cout = w_oihw.shape[0]
    Cpad = _round_up(Cout, LANES)

    # Wrapper-side glue: layout + zero padding (padding=1).
    x_nhwc = jnp.transpose(x_nchw, (0, 2, 3, 1))
    x_pad = jnp.pad(x_nhwc, ((0, 0), (1, 1), (1, 1), (0, 0)))   # (N, H+2, W+2, Cin)
    Hp, Wp = H + 2, W + 2

    # Weights: OIHW -> (kh, kw, cin, cout) -> (9*Cin, Cout), pad Cout to 128.
    w_mat = jnp.transpose(w_oihw, (2, 3, 1, 0)).reshape(KH * KW * Cin, Cout)
    w_mat = jnp.pad(w_mat, ((0, 0), (0, Cpad - Cout))).astype(jnp.float32)

    TH = _pick_h_tile(H, W, Cpad)
    num_h = H // TH
    grid = (N, num_h)
    parallel = pltpu.CompilerParams(
        dimension_semantics=("parallel", "parallel"))

    # ---- pass 1: tiled conv (one MXU dot per tile) + BN partial sums ----
    # TODO(synk): x is kept whole per batch element (same block for every
    # H-tile); a halo-tiled streaming x BlockSpec would be needed for very
    # large images.
    conv_out, stats = pl.pallas_call(
        conv_stats_kernel,
        out_shape=(
            jax.ShapeDtypeStruct((N, H, W, Cpad), jnp.float32),
            jax.ShapeDtypeStruct((N, num_h, 8, Cpad), jnp.float32),
        ),
        grid=grid,
        in_specs=[
            pl.BlockSpec((None, Hp, Wp, Cin), lambda n, h: (n, 0, 0, 0)),
            pl.BlockSpec((KH * KW * Cin, Cpad), lambda n, h: (0, 0)),
        ],
        out_specs=(
            pl.BlockSpec((None, TH, W, Cpad), lambda n, h: (n, h, 0, 0)),
            pl.BlockSpec((None, None, 8, Cpad), lambda n, h: (n, h, 0, 0)),
        ),
        compiler_params=parallel,
    )(x_pad, w_mat)

    # ---- tiny O(Cout) BN math: mean / biased var -> fused scale & shift ----
    count = N * H * W
    ch_sum = jnp.sum(stats[:, :, 0, :], axis=(0, 1))
    ch_sumsq = jnp.sum(stats[:, :, 1, :], axis=(0, 1))
    mean = ch_sum / count
    var = jnp.maximum(ch_sumsq / count - mean * mean, 0.0)
    inv = lax.rsqrt(var + EPS)
    gamma_p = jnp.pad(gamma.astype(jnp.float32), (0, Cpad - Cout))
    beta_p = jnp.pad(beta.astype(jnp.float32), (0, Cpad - Cout))
    scale = (gamma_p * inv).reshape(1, Cpad)
    shift = (beta_p - mean * gamma_p * inv).reshape(1, Cpad)

    # ---- pass 2: lane-dense normalize + ReLU ----
    out_nhwc = pl.pallas_call(
        bn_relu_kernel,
        out_shape=jax.ShapeDtypeStruct((N, H, W, Cpad), x_nchw.dtype),
        grid=grid,
        in_specs=[
            pl.BlockSpec((None, TH, W, Cpad), lambda n, h: (n, h, 0, 0)),
            pl.BlockSpec((1, Cpad), lambda n, h: (0, 0)),
            pl.BlockSpec((1, Cpad), lambda n, h: (0, 0)),
        ],
        out_specs=pl.BlockSpec((None, TH, W, Cpad), lambda n, h: (n, h, 0, 0)),
        compiler_params=parallel,
    )(conv_out, scale, shift)

    return jnp.transpose(out_nhwc[..., :Cout], (0, 3, 1, 2))


def reference(x_nchw, w_oihw, b, gamma, beta):
    """Pure-JAX reference matching PyTorch ConvBlock.forward (training-mode BN)."""
    y = lax.conv_general_dilated(
        x_nchw, w_oihw, window_strides=(1, 1), padding=((1, 1), (1, 1)),
        dimension_numbers=("NCHW", "OIHW", "NCHW"))
    y = y + b[None, :, None, None]
    mean = jnp.mean(y, axis=(0, 2, 3), keepdims=True)
    var = jnp.mean((y - mean) ** 2, axis=(0, 2, 3), keepdims=True)
    y = (y - mean) * lax.rsqrt(var + EPS)
    y = y * gamma[None, :, None, None] + beta[None, :, None, None]
    return jnp.maximum(y, 0.0)


if __name__ == "__main__":
    N, Cin, H, W = 2, 4, 16, 16
    Cout = 8

    key = jax.random.PRNGKey(0)
    kx, kw, kb = jax.random.split(key, 3)
    x = jax.random.normal(kx, (N, Cin, H, W), dtype=jnp.float32)
    # Deterministic synthetic params (shapes from nn.Conv2d / nn.BatchNorm2d).
    w = 0.1 * jax.random.normal(kw, (Cout, Cin, KH, KW), dtype=jnp.float32)
    b = 0.05 * jax.random.normal(kb, (Cout,), dtype=jnp.float32)
    gamma = jnp.ones((Cout,), dtype=jnp.float32)   # BN weight default
    beta = jnp.zeros((Cout,), dtype=jnp.float32)   # BN bias default

    out = jax.block_until_ready(conv_block(x, w, b, gamma, beta))
    ref = jax.block_until_ready(reference(x, w, b, gamma, beta))

    assert out.shape == (N, Cout, H, W)
    np.testing.assert_allclose(np.asarray(out), np.asarray(ref), atol=1e-3, rtol=1e-3)
    print("KERNEL_OK")
</pallas_src>

<mosaic_0001>
module attributes {stable_mosaic.version = 11 : i64} {
  func.func @conv_stats_kernel(%arg0: i32, %arg1: i32, %arg2: memref<1x18x18x4xf32, #tpu.memory_space<vmem>>, %arg3: memref<36x128xf32, #tpu.memory_space<vmem>>, %arg4: memref<1x16x16x128xf32, #tpu.memory_space<vmem>>, %arg5: memref<1x1x8x128xf32, #tpu.memory_space<vmem>>) attributes {dimension_semantics = [#tpu.dimension_semantics<parallel>, #tpu.dimension_semantics<parallel>], iteration_bounds = array<i64: 2, 1>, scalar_prefetch = 0 : i64, scratch_operands = 0 : i64, tpu.core_type = #tpu.core_type<tc>, window_params = [{transform_indices = @transform_0, window_bounds = array<i64: 1, 18, 18, 4>}, {pipeline_mode = #tpu.pipeline_mode<synchronous>, transform_indices = @transform_1, window_bounds = array<i64: 36, 128>}, {transform_indices = @transform_2, window_bounds = array<i64: 1, 16, 16, 128>}, {transform_indices = @transform_3, window_bounds = array<i64: 1, 1, 8, 128>}]} {
    %c16_i32 = arith.constant 16 : i32
    %0 = arith.muli %arg1, %c16_i32 : i32
    %1 = tpu.assume_multiple %0, 16 : i32
    %c0 = arith.constant 0 : index
    %2 = arith.index_cast %1 : i32 to index
    %c0_0 = arith.constant 0 : index
    %c0_1 = arith.constant 0 : index
    %3 = vector.load %arg2[%c0, %2, %c0_0, %c0_1] : memref<1x18x18x4xf32, #tpu.memory_space<vmem>>, vector<1x18x18x4xf32>
    %4 = vector.shape_cast %3 : vector<1x18x18x4xf32> to vector<18x18x4xf32>
    %5 = vector.extract_strided_slice %4 {offsets = [0, 0, 0], sizes = [16, 18, 4], strides = [1, 1, 1]} : vector<18x18x4xf32> to vector<16x18x4xf32>
    %6 = vector.extract_strided_slice %5 {offsets = [0, 0, 0], sizes = [16, 16, 4], strides = [1, 1, 1]} : vector<16x18x4xf32> to vector<16x16x4xf32>
    %7 = vector.extract_strided_slice %5 {offsets = [0, 1, 0], sizes = [16, 16, 4], strides = [1, 1, 1]} : vector<16x18x4xf32> to vector<16x16x4xf32>
    %8 = vector.extract_strided_slice %5 {offsets = [0, 2, 0], sizes = [16, 16, 4], strides = [1, 1, 1]} : vector<16x18x4xf32> to vector<16x16x4xf32>
    %9 = vector.extract_strided_slice %4 {offsets = [1, 0, 0], sizes = [16, 18, 4], strides = [1, 1, 1]} : vector<18x18x4xf32> to vector<16x18x4xf32>
    %10 = vector.extract_strided_slice %9 {offsets = [0, 0, 0], sizes = [16, 16, 4], strides = [1, 1, 1]} : vector<16x18x4xf32> to vector<16x16x4xf32>
    %11 = vector.extract_strided_slice %9 {offsets = [0, 1, 0], sizes = [16, 16, 4], strides = [1, 1, 1]} : vector<16x18x4xf32> to vector<16x16x4xf32>
    %12 = vector.extract_strided_slice %9 {offsets = [0, 2, 0], sizes = [16, 16, 4], strides = [1, 1, 1]} : vector<16x18x4xf32> to vector<16x16x4xf32>
    %13 = vector.extract_strided_slice %4 {offsets = [2, 0, 0], sizes = [16, 18, 4], strides = [1, 1, 1]} : vector<18x18x4xf32> to vector<16x18x4xf32>
    %14 = vector.extract_strided_slice %13 {offsets = [0, 0, 0], sizes = [16, 16, 4], strides = [1, 1, 1]} : vector<16x18x4xf32> to vector<16x16x4xf32>
    %15 = vector.extract_strided_slice %13 {offsets = [0, 1, 0], sizes = [16, 16, 4], strides = [1, 1, 1]} : vector<16x18x4xf32> to vector<16x16x4xf32>
    %16 = vector.extract_strided_slice %13 {offsets = [0, 2, 0], sizes = [16, 16, 4], strides = [1, 1, 1]} : vector<16x18x4xf32> to vector<16x16x4xf32>
    %17 = tpu.concatenate %6, %7, %8, %10, %11, %12, %14, %15, %16 in 2 : vector<16x16x4xf32>, vector<16x16x4xf32>, vector<16x16x4xf32>, vector<16x16x4xf32>, vector<16x16x4xf32>, vector<16x16x4xf32>, vector<16x16x4xf32>, vector<16x16x4xf32>, vector<16x16x4xf32> -> vector<16x16x36xf32>
    %18 = vector.shape_cast %17 : vector<16x16x36xf32> to vector<256x36xf32>
    %c0_2 = arith.constant 0 : index
    %c0_3 = arith.constant 0 : index
    %19 = vector.load %arg3[%c0_2, %c0_3] : memref<36x128xf32, #tpu.memory_space<vmem>>, vector<36x128xf32>
    %cst = arith.constant dense<0.000000e+00> : vector<256x128xf32>
    %20 = tpu.matmul %18, %19, %cst {dimension_numbers = #tpu.dot_dimension_numbers<[1], [0], [0], [1], [0, 0, 1, 1], [], []>} : vector<256x36xf32>, vector<36x128xf32>, vector<256x128xf32> -> vector<256x128xf32>
    %21 = vector.shape_cast %20 : vector<256x128xf32> to vector<16x16x128xf32>
    %c0_4 = arith.constant 0 : index
    %c0_5 = arith.constant 0 : index
    %c0_6 = arith.constant 0 : index
    %c0_7 = arith.constant 0 : index
    %22 = vector.load %arg4[%c0_4, %c0_5, %c0_6, %c0_7] : memref<1x16x16x128xf32, #tpu.memory_space<vmem>>, vector<1x16x16x128xf32>
    %23 = vector.shape_cast %22 : vector<1x16x16x128xf32> to vector<16x16x128xf32>
    %24 = vector.shape_cast %21 : vector<16x16x128xf32> to vector<1x16x16x128xf32>
    tpu.vector_store %arg4[%c0_4, %c0_5, %c0_6, %c0_7], %24 {strides = array<i32>} : memref<1x16x16x128xf32, #tpu.memory_space<vmem>>, vector<1x16x16x128xf32>,
    %cst_8 = arith.constant dense<0.000000e+00> : vector<128xf32>
    %25 = vector.multi_reduction <add>, %20, %cst_8 [0] : vector<256x128xf32> to vector<128xf32>
    %26 = vector.shape_cast %25 : vector<128xf32> to vector<1x128xf32>
    %27 = arith.mulf %20, %20 : vector<256x128xf32>
    %cst_9 = arith.constant dense<0.000000e+00> : vector<128xf32>
    %28 = vector.multi_reduction <add>, %27, %cst_9 [0] : vector<256x128xf32> to vector<128xf32>
    %29 = vector.shape_cast %28 : vector<128xf32> to vector<1x128xf32>
    %cst_10 = arith.constant 0.000000e+00 : f32
    %30 = vector.broadcast %cst_10 : f32 to vector<6x128xf32>
    %31 = tpu.concatenate %26, %29, %30 in 0 : vector<1x128xf32>, vector<1x128xf32>, vector<6x128xf32> -> vector<8x128xf32>
    %c0_11 = arith.constant 0 : index
    %c0_12 = arith.constant 0 : index
    %c0_13 = arith.constant 0 : index
    %c0_14 = arith.constant 0 : index
    %32 = vector.load %arg5[%c0_11, %c0_12, %c0_13, %c0_14] : memref<1x1x8x128xf32, #tpu.memory_space<vmem>>, vector<1x1x8x128xf32>
    %33 = vector.shape_cast %32 : vector<1x1x8x128xf32> to vector<8x128xf32>
    %34 = vector.shape_cast %31 : vector<8x128xf32> to vector<1x1x8x128xf32>
    tpu.vector_store %arg5[%c0_11, %c0_12, %c0_13, %c0_14], %34 {strides = array<i32>} : memref<1x1x8x128xf32, #tpu.memory_space<vmem>>, vector<1x1x8x128xf32>,
    return
  }
  func.func @transform_0(%arg0: i32, %arg1: i32) -> (i32, i32, i32, i32) {
    %c0_i32 = arith.constant 0 : i32
    %c0_i32_0 = arith.constant 0 : i32
    %c0_i32_1 = arith.constant 0 : i32
    %c0_i32_2 = arith.constant 0 : i32
    return %arg0, %c0_i32, %c0_i32_0, %c0_i32_1 : i32, i32, i32, i32
  }
  func.func @transform_1(%arg0: i32, %arg1: i32) -> (i32, i32) {
    %c0_i32 = arith.constant 0 : i32
    %c0_i32_0 = arith.constant 0 : i32
    %c0_i32_1 = arith.constant 0 : i32
    return %c0_i32, %c0_i32_0 : i32, i32
  }
  func.func @transform_2(%arg0: i32, %arg1: i32) -> (i32, i32, i32, i32) {
    %c0_i32 = arith.constant 0 : i32
    %c0_i32_0 = arith.constant 0 : i32
    %c0_i32_1 = arith.constant 0 : i32
    return %arg0, %arg1, %c0_i32, %c0_i32_0 : i32, i32, i32, i32
  }
  func.func @transform_3(%arg0: i32, %arg1: i32) -> (i32, i32, i32, i32) {
    %c0_i32 = arith.constant 0 : i32
    %c0_i32_0 = arith.constant 0 : i32
    %c0_i32_1 = arith.constant 0 : i32
    return %arg0, %arg1, %c0_i32, %c0_i32_0 : i32, i32, i32, i32
  }
}

</mosaic_0001>

<bundles_post_ra>
// kernel: tpu_custom_call.1
= control target key start
LH: loop header
LB: loop body
LE: loop exit
PB: predicated region body
PF: predicated region fallthrough
CT: control target
= control target key end

     0   :  { %9 = vsyncpa [#allocation3], 0  ;;  %s4217_s0 = inlined_call_operand.vmem [shape: f32[2,18,18,4], index: 0, kind: input, shape index: {}]   ;;  %s4218_s1 = inlined_call_operand.vmem [shape: f32[36,128], index: 1, kind: input, shape index: {}]   ;;  %s4219_s2 = inlined_call_operand.hbm [shape: f32[2,16,16,128], index: 2, kind: output, shape index: {0}]   ;;  %s4220_s3 = inlined_call_operand.hbm [shape: f32[2,1,8,128], index: 3, kind: output, shape index: {1}]  }
   0x1   :  { %11 = vsyncpa [#allocation3 + $0x1], 0 }
   0x2   :  { %12 = vsyncpa [#allocation5], 0 }
   0x3   :  { %14 = vsyncpa [#allocation5 + $0x1], 0  ;;  %s2522_s12 = smov 0   ;;  %s2524_s13 = smov 0  }
   0x4   :  { %s2526_s14 = smov 0   ;;  %s2528_s15 = smov 0  }
   0x5   :  { %s2530_s16 = smov 0   ;;  %s2532_s17 = smov 0  }
   0x6 LB: > { %s2140_s18 = sadd.s32 4294967295, %s2489_s17   ;;  %s2141_s19 = sadd.s32 4294967294, %s2489_s17   ;;  %s2489_s17 = sphi %s2532_s17, %s20_s17   ;;  %s2485_s16 = sphi %s2530_s16, %s4457_s16   ;;  %s2481_s15 = sphi %s2528_s15, %s4456_s15   ;;  %s2477_s14 = sphi %s2526_s14, %s4455_s14   ;;  %s2473_s13 = sphi %s2524_s13, %s4454_s13   ;;  %s2469_s12 = sphi %s2522_s12, %s4453_s12  }
   0x7   : > { %s32_s20 = sadd.s32 1, %s2485_s16  ;;  %s88_s21 = sadd.s32 1, %s2477_s14 }
   0x8   : > { %p34_p0 = scmp.ge.s32.totalorder %s32_s20, 2  ;;  %p98_p1 = scmp.ne.s32.totalorder %s2477_s14, %s2473_s13 }
   0x9   : > { %p99_p2 = scmp.eq.s32.totalorder %s2140_s18, 1  ;;  %p104_p3 = scmp.ne.s32.totalorder %s2473_s13, %s2469_s12 }
   0xa   : > { %s4459_s20 = smov (%p34_p0, %s32_s20), 0  ;;  %p105_p5 = scmp.eq.s32.totalorder %s2141_s19, 1 }
   0xb   : > { %p2562_p4 = por %p99_p2, %p98_p1  ;;  %s83_s23 = ssub.s32 %s2485_s16, %s4459_s20 }
   0xc   : > { %p2144_p6 = scmp.ge.s32.totalorder %s2489_s17, 1  ;;  %p86_p7 = scmp.eq.s32.totalorder %s83_s23, 0 }
   0xd   : > { %p2569_p8 = por %p105_p5, %p104_p3  ;;  %p162_p9 = scmp.lt.s32.totalorder %s2489_s17, 3 }
   0xe   : > { %s2575_s25 = scalar_select %p86_p7, %s2477_s14, %s88_s21  }
   0xf   : > { %p163_p10 = pnand %p2144_p6, %p162_p9 }
  0x11   : > { %166 = sbr.rel (%p163_p10) target bundleno = 897 (0x381), region = 28 }
  0x16   : > { %p191_p11 = scmp.lt.s32.totalorder %s2481_s15, 1  ;;  %vm302_vm0 = vcmask 1046528   ;;  %s2491_s4 = smov 4   ;;  %vm479_vm1 = vcmask 1045504   ;;  %vm1624_vm2 = vcmask 1043456   ;;  %vm1258_vm3 = vcmask 31744  }
  0x17   : > { %s2492_s5 = smov 8   ;;  %s2493_s6 = smov 12   ;;  %vm1291_vm4 = vcmask 64512   ;;  %vm1324_vm5 = vcmask 97280   ;;  %vm1357_vm6 = vcmask 130048   ;;  %vm1390_vm7 = vcmask 162816  }
  0x18   : > { %s192_s26 = scalar_select %p191_p11, %s2481_s15, 1  ;;  %vm1423_vm8 = vcmask 195584   ;;  %vm1456_vm9 = vcmask 228352   ;;  %vm1489_vm10 = vcmask 261120   ;;  %vm1527_vm11 = vcmask 293888  }
  0x19   : > { %s2494_s7 = smov 16   ;;  %s2495_s10 = smov 20  }
  0x1a   : > { %s2294_s27 = smul.u32 432, %s192_s26  ;;  %s2496_s23 = smov 24  }
  0x1b   : > { %s2498_s8 = smov 32   ;;  %s2188_s9 = sshll.u32 %s2481_s15, 12 }
  0x1c   : > { %s2582_s30 = scalar_lea.vmem %s4217_s0, %s2294_s27  ;;  %s4141_s19 = scalar_lea.hbm %s4219_s2, %s2188_s9 }
  0x1d   : > { %v2585_v0 = vld [vmem:[%s2582_s30 + $0x18] sm:$0xff]  ;;  %v2588_v1 = vld [vmem:[%s2582_s30 + $0x20] sm:$0xff]  ;;  %v2596_v5 = vld [vmem:[%s2582_s30 + $0x8] sm:$0xff]  ;;  %s2499_s26 = smov [#allocation2]  }
  0x1e   : > { %v2591_v2 = vld [vmem:[%s2582_s30] sm:$0xff]  ;;  %v308_v3 = vrot.slane %v2585_v0, 1  ;;  %v309_v4 = vrot.slane %v2588_v1, 1  ;;  %v2600_v7 = vld [vmem:[%s2582_s30 + $0x28] sm:$0x3]  ;;  %v304_v8 = vrot.slane %v2596_v5, 1 }
  0x1f   : > { %v303_v6 = vrot.slane %v2591_v2, 1  ;;  %v311_v9 = vrot.slane %v2600_v7, 1  ;;  %v2605_v10 = vld [vmem:[%s2582_s30 + $0x10] sm:$0x3]  ;;  %v2608_v11 = vld [vmem:[%s2582_s30 + $0x38] sm:$0xff]  ;;  %v2638_v24 = vld [vmem:[%s2582_s30 + $0x48] sm:$0xff] }
  0x20   : > { %v2611_v12 = vsel %vm302_vm0, %v308_v3, %v309_v4  ;;  %v306_v13 = vrot.slane %v2605_v10, 1  ;;  %v2615_v14 = vld [vmem:[%s2582_s30 + $0x40] sm:$0x3]  ;;  %v2618_v15 = vld [vmem:[%s2582_s30 + $0x30] sm:$0xff]  ;;  %v314_v18 = vrot.slane %v2608_v11, 1  ;;  %v318_v29 = vrot.slane %v2638_v24, 1 }
  0x21   : > { %387 = vrot.lane.b32.xlu1 %v2611_v12, %s2491_s4  ;;  %v305_v16 = vsel %vm302_vm0, %v303_v6, %v304_v8  ;;  %v2625_v17 = vsel %vm302_vm0, %v309_v4, %v311_v9  ;;  %v316_v19 = vrot.slane %v2615_v14, 1  ;;  %v313_v21 = vrot.slane %v2618_v15, 1  ;;  %v2632_v22 = vld [vmem:[%s2582_s30 + $0x50] sm:$0xff]  ;;  %v2635_v23 = vld [vmem:[%s2582_s30 + $0x58] sm:$0x3]  ;;  %v2653_v30 = vld [vmem:[%s2582_s30 + $0x68] sm:$0xff] }
  0x22   : > { %383 = vrot.lane.b32.xlu0 %v305_v16, %s2491_s4  ;;  %v307_v20 = vsel %vm302_vm0, %v304_v8, %v306_v13  ;;  %v319_v26 = vrot.slane %v2632_v22, 1  ;;  %v321_v27 = vrot.slane %v2635_v23, 1  ;;  %v2656_v31 = vld [vmem:[%s2582_s30 + $0x70] sm:$0x3]  ;;  %v2659_v32 = vld [vmem:[%s2582_s30 + $0x60] sm:$0xff]  ;;  %v324_v34 = vrot.slane %v2653_v30, 1 }
  0x23   : > { %v2644_v25 = vsel %vm302_vm0, %v314_v18, %v316_v19  ;;  %v2649_v28 = vsel %vm302_vm0, %v313_v21, %v314_v18  ;;  %v326_v35 = vrot.slane %v2656_v31, 1  ;;  %v323_v37 = vrot.slane %v2659_v32, 1  ;;  %v2675_v38 = vld [vmem:[%s2582_s30 + $0x80] sm:$0xff]  ;;  %v2678_v39 = vld [vmem:[%s2582_s30 + $0x88] sm:$0x3]  ;;  %v2681_v40 = vld [vmem:[%s2582_s30 + $0x78] sm:$0xff] }
  0x24   : > { %v2666_v33 = vsel %vm302_vm0, %v319_v26, %v321_v27  ;;  %v2671_v36 = vsel %vm302_vm0, %v318_v29, %v319_v26  ;;  %v329_v42 = vrot.slane %v2675_v38, 1  ;;  %v331_v43 = vrot.slane %v2678_v39, 1  ;;  %v2697_v46 = vld [vmem:[%s2582_s30 + $0x98] sm:$0xff]  ;;  %v2700_v47 = vld [vmem:[%s2582_s30 + $0xa0] sm:$0x3]  ;;  %v2703_v48 = vld [vmem:[%s2582_s30 + $0x90] sm:$0xff] }
  0x25   : > { %389 = vrot.lane.b32.xlu1 %v2625_v17, %s2491_s4  ;;  %4321 = vst [vmem:[#allocation8_spill] sm:$0xff] %v2666_v33  ;;  %v2688_v41 = vsel %vm302_vm0, %v324_v34, %v326_v35  ;;  %v2693_v44 = vsel %vm302_vm0, %v323_v37, %v324_v34  ;;  %v328_v45 = vrot.slane %v2681_v40, 1  ;;  %v334_v50 = vrot.slane %v2697_v46, 1  ;;  %v2719_v54 = vld [vmem:[%s2582_s30 + $0xb0] sm:$0xff]  ;;  %v2722_v55 = vld [vmem:[%s2582_s30 + $0xb8] sm:$0x3] }
  0x26   : > { %385 = vrot.lane.b32.xlu0 %v307_v20, %s2491_s4  ;;  %4322 = vst [vmem:[#allocation9_spill] sm:$0xff] %v2688_v41  ;;  %4323 = vst [vmem:[#allocation10_spill] sm:$0xff] %v2693_v44  ;;  %v2710_v49 = vsel %vm302_vm0, %v329_v42, %v331_v43  ;;  %v336_v51 = vrot.slane %v2700_v47, 1  ;;  %v333_v53 = vrot.slane %v2703_v48, 1  ;;  %v2725_v56 = vld [vmem:[%s2582_s30 + $0xa8] sm:$0xff]  ;;  %v339_v58 = vrot.slane %v2719_v54, 1 }
  0x27   : > { %4324 = vst [vmem:[#allocation11_spill] sm:$0xff] %v2710_v49  ;;  %v2715_v52 = vsel %vm302_vm0, %v328_v45, %v329_v42  ;;  %v341_v59 = vrot.slane %v2722_v55, 1  ;;  %v338_v61 = vrot.slane %v2725_v56, 1  ;;  %v2741_v62 = vld [vmem:[%s2582_s30 + $0xc8] sm:$0xff]  ;;  %v2744_v63 = vld [vmem:[%s2582_s30 + $0xd0] sm:$0x3] }
  0x28   : > { %4325 = vst [vmem:[#allocation12_spill] sm:$0xff] %v2715_v52  ;;  %v2732_v57 = vsel %vm302_vm0, %v334_v50, %v336_v51  ;;  %v2737_v60 = vsel %vm302_vm0, %v333_v53, %v334_v50  ;;  %v2747_v3 = vld [vmem:[%s2582_s30 + $0xc0] sm:$0xff]  ;;  %v344_v6 = vrot.slane %v2741_v62, 1  ;;  %v346_v8 = vrot.slane %v2744_v63, 1  ;;  %v2766_v18 = vld [vmem:[%s2582_s30 + $0xe8] sm:$0x3] }
  0x29   : > { %393 = vrot.lane.b32.xlu1 %v2644_v25, %s2491_s4  ;;  %4326 = vst [vmem:[#allocation13_spill] sm:$0xff] %v2732_v57  ;;  %4327 = vst [vmem:[#allocation14_spill] sm:$0xff] %v2737_v60  ;;  %v2754_v4 = vsel %vm302_vm0, %v339_v58, %v341_v59  ;;  %v2759_v9 = vsel %vm302_vm0, %v338_v61, %v339_v58  ;;  %v343_v13 = vrot.slane %v2747_v3, 1  ;;  %v2763_v16 = vld [vmem:[%s2582_s30 + $0xe0] sm:$0xff]  ;;  %v2769_v19 = vld [vmem:[%s2582_s30 + $0xd8] sm:$0xff]  ;;  %v351_v26 = vrot.slane %v2766_v18, 1 }
  0x2a   : > { %391 = vrot.lane.b32.xlu0 %v2649_v28, %s2491_s4  ;;  %4328 = vst [vmem:[#allocation15_spill] sm:$0xff] %v2754_v4  ;;  %4329 = vst [vmem:[#allocation16_spill] sm:$0xff] %v2759_v9  ;;  %v2776_v20 = vsel %vm302_vm0, %v344_v6, %v346_v8  ;;  %v349_v21 = vrot.slane %v2763_v16, 1  ;;  %v348_v29 = vrot.slane %v2769_v19, 1  ;;  %v2785_v34 = vld [vmem:[%s2582_s30 + $0xf8] sm:$0xff]  ;;  %v2791_v37 = vld [vmem:[%s2582_s30 + $0xf0] sm:$0xff] }
  0x2b   : > { %4330 = vst [vmem:[#allocation17_spill] sm:$0xff] %v2776_v20  ;;  %v2781_v27 = vsel %vm302_vm0, %v343_v13, %v344_v6  ;;  %v2788_v35 = vld [vmem:[%s2582_s30 + $0x100] sm:$0x3]  ;;  %v354_v43 = vrot.slane %v2785_v34, 1  ;;  %v353_v51 = vrot.slane %v2791_v37, 1  ;;  %v2807_v53 = vld [vmem:[%s2582_s30 + $0x110] sm:$0xff] }
  0x2c   : > { %4331 = vst [vmem:[#allocation18_spill] sm:$0xff] %v2781_v27  ;;  %v2798_v42 = vsel %vm302_vm0, %v349_v21, %v351_v26  ;;  %v356_v45 = vrot.slane %v2788_v35, 1  ;;  %v2803_v50 = vsel %vm302_vm0, %v348_v29, %v349_v21  ;;  %v2810_v58 = vld [vmem:[%s2582_s30 + $0x118] sm:$0x3]  ;;  %v2813_v59 = vld [vmem:[%s2582_s30 + $0x108] sm:$0xff]  ;;  %v359_v6 = vrot.slane %v2807_v53, 1 }
  0x2d   : > { %397 = vrot.lane.b32.xlu1 %v2666_v33, %s2491_s4  ;;  %4332 = vst [vmem:[#allocation19_spill] sm:$0xff] %v2798_v42  ;;  %4333 = vst [vmem:[#allocation20_spill] sm:$0xff] %v2803_v50  ;;  %v361_v8 = vrot.slane %v2810_v58, 1  ;;  %v2825_v13 = vsel %vm302_vm0, %v353_v51, %v354_v43  ;;  %v358_v21 = vrot.slane %v2813_v59, 1  ;;  %v2829_v26 = vld [vmem:[%s2582_s30 + $0x128] sm:$0xff]  ;;  %s2387_s27 = sshll.u32 %s2499_s26, 4  ;;  %s2388_s27 = int_to_ptr.vmem [resolvable:$false] %s2387_s27 }
  0x2e   : > { %395 = vrot.lane.b32.xlu0 %v2671_v36, %s2491_s4  ;;  %v2820_v61 = vsel %vm302_vm0, %v354_v43, %v356_v45  ;;  %4335 = vst [vmem:[#allocation22_spill] sm:$0xff] %v2825_v13  ;;  %v2832_v29 = vld [vmem:[%s2582_s30 + $0x130] sm:$0x3]  ;;  %v364_v43 = vrot.slane %v2829_v26, 1  ;;  %s2389_s28 = scalar_lea.vmem %s2388_s27, 8192 }
  0x2f   : > { %4334 = vst [vmem:[#allocation21_spill] sm:$0xff] %v2820_v61  ;;  %v2842_v45 = vsel %vm302_vm0, %v359_v6, %v361_v8  ;;  %v366_v51 = vrot.slane %v2832_v29, 1 }
  0x30   : > { %4336 = vst [vmem:[#allocation23_spill] sm:$0xff] %v2842_v45 }
  0x31   : > { %401 = vrot.lane.b32.xlu1 %v2688_v41, %s2491_s4  ;;  %v2864_v8 = vsel %vm302_vm0, %v364_v43, %v366_v51  ;;  %v2898_v41 = vld [vmem:[%s2582_s30 + $0x178] sm:$0x3] }
  0x32   : > { %399 = vrot.lane.b32.xlu0 %v2693_v44, %s2491_s4  ;;  %4338 = vst [vmem:[#allocation25_spill] sm:$0xff] %v2864_v8 }
  0x35   : > { %405 = vrot.lane.b32.xlu1 %v2710_v49, %s2491_s4 }
  0x36   : > { %403 = vrot.lane.b32.xlu0 %v2715_v52, %s2491_s4  ;;  %v2895_v52 = vld [vmem:[%s2582_s30 + $0x170] sm:$0xff] }
  0x37   : > { %4342 = vst [vmem:[#allocation29_spill] sm:$0xff] %v2895_v52 }
  0x39   : > { %409 = vrot.lane.b32.xlu1 %v2732_v57, %s2491_s4  ;;  %v2873_v57 = vld [vmem:[%s2582_s30 + $0x158] sm:$0xff] }
  0x3a   : > { %407 = vrot.lane.b32.xlu0 %v2737_v60, %s2491_s4 }
  0x3d   : > { %413 = vrot.lane.b32.xlu1 %v2754_v4, %s2491_s4 }
  0x3e   : > { %411 = vrot.lane.b32.xlu0 %v2759_v9, %s2491_s4 }
  0x41   : > { %417 = vrot.lane.b32.xlu1 %v2776_v20, %s2491_s4 }
  0x42   : > { %415 = vrot.lane.b32.xlu0 %v2781_v27, %s2491_s4  ;;  %v2851_v27 = vld [vmem:[%s2582_s30 + $0x140] sm:$0xff] }
  0x45   : > { %421 = vrot.lane.b32.xlu1 %v2798_v42, %s2491_s4  ;;  %v2835_v42 = vld [vmem:[%s2582_s30 + $0x120] sm:$0xff] }
  0x46   : > { %419 = vrot.lane.b32.xlu0 %v2803_v50, %s2491_s4  ;;  %v2847_v50 = vsel %vm302_vm0, %v358_v21, %v359_v6  ;;  %v363_v20 = vrot.slane %v2835_v42, 1  ;;  %v369_v6 = vrot.slane %v2851_v27, 1 }
  0x47   : > { %4337 = vst [vmem:[#allocation24_spill] sm:$0xff] %v2847_v50 }
  0x48   : > { %v2869_v4 = vsel %vm302_vm0, %v363_v20, %v364_v43  ;;  %v374_v20 = vrot.slane %v2873_v57, 1 }
  0x49   : > { %425 = vrot.lane.b32.xlu1 %v2820_v61, %s2491_s4  ;;  %v2854_v61 = vld [vmem:[%s2582_s30 + $0x148] sm:$0x3]  ;;  %4339 = vst [vmem:[#allocation26_spill] sm:$0xff] %v2869_v4 }
  0x4a   : > { %423 = vrot.lane.b32.xlu0 %v2825_v13, %s2491_s4  ;;  %v2857_v13 = vld [vmem:[%s2582_s30 + $0x138] sm:$0xff]  ;;  %v371_v21 = vrot.slane %v2854_v61, 1 }
  0x4b   : > { %v368_v9 = vrot.slane %v2857_v13, 1 }
  0x4c   : > { %v2886_v51 = vsel %vm302_vm0, %v369_v6, %v371_v21 }
  0x4d   : > { %429 = vrot.lane.b32.xlu1 %v2842_v45, %s2491_s4  ;;  %v2876_v45 = vld [vmem:[%s2582_s30 + $0x160] sm:$0x3]  ;;  %4340 = vst [vmem:[#allocation27_spill] sm:$0xff] %v2886_v51  ;;  %v2891_v60 = vsel %vm302_vm0, %v368_v9, %v369_v6  ;;  %v379_v9 = vrot.slane %v2895_v52, 1  ;;  %v381_v6 = vrot.slane %v2898_v41, 1 }
  0x4e   : > { %427 = vrot.lane.b32.xlu0 %v2847_v50, %s2491_s4  ;;  %v2879_v50 = vld [vmem:[%s2582_s30 + $0x150] sm:$0xff]  ;;  %v376_v43 = vrot.slane %v2876_v45, 1  ;;  %4341 = vst [vmem:[#allocation28_spill] sm:$0xff] %v2891_v60 }
  0x4f   : > { %v373_v49 = vrot.slane %v2879_v50, 1 }
  0x50   : > { %v2908_v21 = vsel %vm302_vm0, %v374_v20, %v376_v43  ;;  %v481_v43 = vrot.slane %v2596_v5, 2  ;;  %v488_v5 = vrot.slane %v2600_v7, 2  ;;  %v490_v7 = vrot.slane %v2618_v15, 2 }
  0x51   : > { %433 = vrot.lane.b32.xlu1 %v2864_v8, %s2491_s4  ;;  %v2901_v8 = vld [vmem:[%s2582_s30 + $0x168] sm:$0xff]  ;;  %4344 = vst [vmem:[#allocation31_spill] sm:$0xff] %v2908_v21 }
  0x52   : > { %431 = vrot.lane.b32.xlu0 %v2869_v4, %s2491_s4  ;;  %4343 = vst [vmem:[#allocation30_spill] sm:$0xff] %v2901_v8  ;;  %v2913_v4 = vsel %vm302_vm0, %v373_v49, %v374_v20  ;;  %v378_v44 = vrot.slane %v2901_v8, 1  ;;  %v480_v49 = vrot.slane %v2591_v2, 2 }
  0x53   : > { %4345 = vst [vmem:[#allocation32_spill] sm:$0xff] %v2913_v4 }
  0x54   : > { %v2926_v33 = vsel %vm302_vm0, %v378_v44, %v379_v9  ;;  %v485_v44 = vrot.slane %v2585_v0, 2 }
  0x55   : > { %437 = vrot.lane.b32.xlu1 %v2886_v51, %s2491_s4  ;;  %v2921_v51 = vsel %vm302_vm0, %v379_v9, %v381_v6  ;;  %4347 = vst [vmem:[#allocation34_spill] sm:$0xff] %v2926_v33  ;;  %v486_v6 = vrot.slane %v2588_v1, 2  ;;  %v491_v9 = vrot.slane %v2608_v11, 2 }
  0x56   : > { %435 = vrot.lane.b32.xlu0 %v2891_v60, %s2491_s4  ;;  %4346 = vst [vmem:[#allocation33_spill] sm:$0xff] %v2921_v51  ;;  %v483_v60 = vrot.slane %v2605_v10, 2  ;;  %v482_v10 = vsel %vm479_vm1, %v480_v49, %v481_v43  ;;  %v496_v49 = vrot.slane %v2632_v22, 2 }
  0x57   : > { %v2941_v2 = vsel %vm479_vm1, %v486_v6, %v488_v5 }
  0x58   : > { %v484_v20 = vsel %vm479_vm1, %v481_v43, %v483_v60  ;;  %v493_v60 = vrot.slane %v2615_v14, 2  ;;  %v2959_v14 = vsel %vm479_vm1, %v490_v7, %v491_v9  ;;  %v506_v7 = vrot.slane %v2675_v38, 2 }
  0x59   : > { %441 = vrot.lane.b32.xlu1 %v2908_v21, %s2491_s4  ;;  %v518_v21 = vrot.slane %v2722_v55, 2 }
  0x5a   : > { %439 = vrot.lane.b32.xlu0 %v2913_v4, %s2491_s4  ;;  %v2954_v43 = vsel %vm479_vm1, %v491_v9, %v493_v60  ;;  %v500_v9 = vrot.slane %v2659_v32, 2  ;;  %v523_v4 = vrot.slane %v2744_v63, 2 }
  0x5d   : > { %445 = vrot.lane.b32.xlu1 %v2921_v51, %s2491_s4  ;;  %v2946_v51 = vsel %vm479_vm1, %v485_v44, %v486_v6  ;;  %v495_v6 = vrot.slane %v2638_v24, 2  ;;  %v503_v44 = vrot.slane %v2656_v31, 2 }
  0x5e   : > { %443 = vrot.lane.b32.xlu0 %v2926_v33, %s2491_s4  ;;  %v513_v33 = vrot.slane %v2700_v47, 2  ;;  %s2497_s4 = smov 28  }
  0x61   : > { %562 = vrot.lane.b32.xlu1 %v484_v20, %s2492_s5  ;;  %v498_v20 = vrot.slane %v2635_v23, 2  ;;  %v2972_v23 = vsel %vm479_vm1, %v495_v6, %v496_v49 }
  0x62   : > { %560 = vrot.lane.b32.xlu0 %v482_v10, %s2492_s5  ;;  %v501_v10 = vrot.slane %v2653_v30, 2 }
  0x63   : > { %v2967_v5 = vsel %vm479_vm1, %v496_v49, %v498_v20  ;;  %v508_v20 = vrot.slane %v2678_v39, 2  ;;  %v505_v49 = vrot.slane %v2681_v40, 2 }
  0x64   : > { %v2980_v60 = vsel %vm479_vm1, %v501_v10, %v503_v44  ;;  %v2985_v31 = vsel %vm479_vm1, %v500_v9, %v501_v10  ;;  %v511_v44 = vrot.slane %v2697_v46, 2  ;;  %v510_v10 = vrot.slane %v2703_v48, 2 }
  0x65   : > { %566 = vrot.lane.b32.xlu1 %v2941_v2, %s2492_s5  ;;  %4348 = vst [vmem:[#allocation35_spill] sm:$0xff] %v2980_v60  ;;  %v2993_v6 = vsel %vm479_vm1, %v506_v7, %v508_v20  ;;  %v2998_v39 = vsel %vm479_vm1, %v505_v49, %v506_v7  ;;  %v516_v20 = vrot.slane %v2719_v54, 2  ;;  %v515_v7 = vrot.slane %v2725_v56, 2 }
  0x66   : > { %564 = vrot.lane.b32.xlu0 %v2946_v51, %s2492_s5  ;;  %4349 = vst [vmem:[#allocation36_spill] sm:$0xff] %v2993_v6  ;;  %4350 = vst [vmem:[#allocation37_spill] sm:$0xff] %v2998_v39  ;;  %v3006_v9 = vsel %vm479_vm1, %v511_v44, %v513_v33  ;;  %v3011_v47 = vsel %vm479_vm1, %v510_v10, %v511_v44  ;;  %v521_v33 = vrot.slane %v2741_v62, 2  ;;  %v520_v44 = vrot.slane %v2747_v3, 2 }
  0x67   : > { %4351 = vst [vmem:[#allocation38_spill] sm:$0xff] %v3006_v9  ;;  %4352 = vst [vmem:[#allocation39_spill] sm:$0xff] %v3011_v47  ;;  %v3019_v49 = vsel %vm479_vm1, %v516_v20, %v518_v21  ;;  %v3024_v55 = vsel %vm479_vm1, %v515_v7, %v516_v20  ;;  %v526_v21 = vrot.slane %v2763_v16, 2  ;;  %v525_v20 = vrot.slane %v2769_v19, 2 }
  0x68   : > { %4353 = vst [vmem:[#allocation40_spill] sm:$0xff] %v3019_v49  ;;  %4354 = vst [vmem:[#allocation41_spill] sm:$0xff] %v3024_v55  ;;  %v3032_v10 = vsel %vm479_vm1, %v521_v33, %v523_v4  ;;  %v3037_v63 = vsel %vm479_vm1, %v520_v44, %v521_v33  ;;  %v531_v4 = vrot.slane %v2785_v34, 2  ;;  %v530_v33 = vrot.slane %v2791_v37, 2 }
  0x69   : > { %570 = vrot.lane.b32.xlu1 %v2954_v43, %s2492_s5  ;;  %4355 = vst [vmem:[#allocation42_spill] sm:$0xff] %v3032_v10  ;;  %4356 = vst [vmem:[#allocation43_spill] sm:$0xff] %v3037_v63 }
  0x6a   : > { %568 = vrot.lane.b32.xlu0 %v2959_v14, %s2492_s5 }
  0x6d   : > { %574 = vrot.lane.b32.xlu1 %v2967_v5, %s2492_s5 }
  0x6e   : > { %572 = vrot.lane.b32.xlu0 %v2972_v23, %s2492_s5 }
  0x71   : > { %578 = vrot.lane.b32.xlu1 %v2980_v60, %s2492_s5 }
  0x72   : > { %576 = vrot.lane.b32.xlu0 %v2985_v31, %s2492_s5 }
  0x75   : > { %582 = vrot.lane.b32.xlu1 %v2993_v6, %s2492_s5 }
  0x76   : > { %580 = vrot.lane.b32.xlu0 %v2998_v39, %s2492_s5 }
  0x79   : > { %586 = vrot.lane.b32.xlu1 %v3006_v9, %s2492_s5  ;;  %v528_v9 = vrot.slane %v2766_v18, 2  ;;  %v3050_v18 = vsel %vm479_vm1, %v525_v20, %v526_v21 }
  0x7a   : > { %584 = vrot.lane.b32.xlu0 %v3011_v47, %s2492_s5  ;;  %4358 = vst [vmem:[#allocation45_spill] sm:$0xff] %v3050_v18 }
  0x7b   : > { %v3045_v7 = vsel %vm479_vm1, %v526_v21, %v528_v9  ;;  %v536_v9 = vrot.slane %v2807_v53, 2  ;;  %v535_v21 = vrot.slane %v2813_v59, 2 }
  0x7c   : > { %4357 = vst [vmem:[#allocation44_spill] sm:$0xff] %v3045_v7 }
  0x7d   : > { %590 = vrot.lane.b32.xlu1 %v3019_v49, %s2492_s5  ;;  %v533_v49 = vrot.slane %v2788_v35, 2  ;;  %v3063_v35 = vsel %vm479_vm1, %v530_v33, %v531_v4 }
  0x7e   : > { %588 = vrot.lane.b32.xlu0 %v3024_v55, %s2492_s5  ;;  %4360 = vst [vmem:[#allocation47_spill] sm:$0xff] %v3063_v35 }
  0x7f   : > { %v3058_v44 = vsel %vm479_vm1, %v531_v4, %v533_v49  ;;  %v541_v49 = vrot.slane %v2829_v26, 2  ;;  %v540_v4 = vrot.slane %v2835_v42, 2 }
  0x80   : > { %4359 = vst [vmem:[#allocation46_spill] sm:$0xff] %v3058_v44 }
  0x81   : > { %594 = vrot.lane.b32.xlu1 %v3032_v10, %s2492_s5  ;;  %v538_v10 = vrot.slane %v2810_v58, 2  ;;  %v3076_v58 = vsel %vm479_vm1, %v535_v21, %v536_v9 }
  0x82   : > { %592 = vrot.lane.b32.xlu0 %v3037_v63, %s2492_s5  ;;  %4362 = vst [vmem:[#allocation49_spill] sm:$0xff] %v3076_v58 }
  0x83   : > { %v3071_v20 = vsel %vm479_vm1, %v536_v9, %v538_v10  ;;  %v546_v10 = vrot.slane %v2851_v27, 2  ;;  %v545_v9 = vrot.slane %v2857_v13, 2 }
  0x84   : > { %4361 = vst [vmem:[#allocation48_spill] sm:$0xff] %v3071_v20 }
  0x85   : > { %598 = vrot.lane.b32.xlu1 %v3045_v7, %s2492_s5  ;;  %v543_v7 = vrot.slane %v2832_v29, 2  ;;  %v3089_v29 = vsel %vm479_vm1, %v540_v4, %v541_v49 }
  0x86   : > { %596 = vrot.lane.b32.xlu0 %v3050_v18, %s2492_s5  ;;  %4364 = vst [vmem:[#allocation51_spill] sm:$0xff] %v3089_v29 }
  0x87   : > { %v3084_v33 = vsel %vm479_vm1, %v541_v49, %v543_v7  ;;  %v551_v7 = vrot.slane %v2873_v57, 2  ;;  %v550_v49 = vrot.slane %v2879_v50, 2 }
  0x88   : > { %4363 = vst [vmem:[#allocation50_spill] sm:$0xff] %v3084_v33 }
  0x89   : > { %602 = vrot.lane.b32.xlu1 %v3058_v44, %s2492_s5  ;;  %v548_v44 = vrot.slane %v2854_v61, 2  ;;  %v3104_v61 = vsel %vm479_vm1, %v545_v9, %v546_v10  ;;  %v555_v9 = vrot.slane %v2901_v8, 2  ;;  %v1526_v8 = vld [vmem:[%s4218_s1 + $0x20] sm:$0xf] }
  0x8a   : > { %600 = vrot.lane.b32.xlu0 %v3063_v35, %s2492_s5  ;;  %4367 = vst [vmem:[#allocation54_spill] sm:$0xff] %v3104_v61  ;;  %2226 = vmatprep.subr.msk.mxu0 %vm1624_vm2, %v1526_v8 }
  0x8b   : > { %v3097_v21 = vsel %vm479_vm1, %v546_v10, %v548_v44  ;;  %v3121_v10 = vsel %vm479_vm1, %v550_v49, %v551_v7  ;;  %2284 = vmatprep.subr.msk.mxu1 %vm1624_vm2, %v1526_v8  ;;  %2227 = vmatpush3.msk.msra.mxu0 %vm1624_vm2, %v1526_v8 }
  0x8c   : > { %4365 = vst [vmem:[#allocation52_spill] sm:$0xff] %v3097_v21  ;;  %4371 = vst [vmem:[#allocation58_spill] sm:$0xff] %v3121_v10  ;;  %2289 = vmatpush3.msk.msra.mxu1 %vm1624_vm2, %v1526_v8 }
  0x8d   : > { %606 = vrot.lane.b32.xlu1 %v3071_v20, %s2492_s5  ;;  %v553_v20 = vrot.slane %v2876_v45, 2  ;;  %v556_v45 = vrot.slane %v2895_v52, 2 }
  0x8e   : > { %604 = vrot.lane.b32.xlu0 %v3076_v58, %s2492_s5 }
  0x8f   : > { %v3114_v44 = vsel %vm479_vm1, %v551_v7, %v553_v20 }
  0x90   : > { %4369 = vst [vmem:[#allocation56_spill] sm:$0xff] %v3114_v44 }
  0x91   : > { %610 = vrot.lane.b32.xlu1 %v3084_v33, %s2492_s5  ;;  %v558_v33 = vrot.slane %v2898_v41, 2  ;;  %v3136_v41 = vsel %vm479_vm1, %v555_v9, %v556_v45 }
  0x92   : > { %608 = vrot.lane.b32.xlu0 %v3089_v29, %s2492_s5  ;;  %4375 = vst [vmem:[#allocation62_spill] sm:$0xff] %v3136_v41 }
  0x93   : > { %v3101_v58 = vpop.permute.xlu1 %387  ;;  %v3131_v20 = vsel %vm479_vm1, %v556_v45, %v558_v33 }
  0x94   : > { %4366 = vst [vmem:[#allocation53_spill] sm:$0xff] %v3101_v58  ;;  %v3107_v4 = vpop.permute.xlu0 %383  ;;  %4373 = vst [vmem:[#allocation60_spill] sm:$0xff] %v3131_v20 }
  0x95   : > { %4368 = vst [vmem:[#allocation55_spill] sm:$0xff] %v3107_v4  ;;  %614 = vrot.lane.b32.xlu1 %v3097_v21, %s2492_s5 }
  0x96   : > { %612 = vrot.lane.b32.xlu0 %v3104_v61, %s2492_s5 }
  0x97   : > { %v3118_v29 = vpop.permute.xlu1 %389 }
  0x98   : > { %4370 = vst [vmem:[#allocation57_spill] sm:$0xff] %v3118_v29  ;;  %v3124_v35 = vpop.permute.xlu0 %385 }
  0x99   : > { %4372 = vst [vmem:[#allocation59_spill] sm:$0xff] %v3124_v35  ;;  %618 = vrot.lane.b32.xlu1 %v3114_v44, %s2492_s5 }
  0x9a   : > { %616 = vrot.lane.b32.xlu0 %v3121_v10, %s2492_s5 }
  0x9b   : > { %v3133_v21 = vpop.permute.xlu1 %393 }
  0x9c   : > { %4374 = vst [vmem:[#allocation61_spill] sm:$0xff] %v3133_v21  ;;  %v3138_v7 = vpop.permute.xlu0 %391 }
  0x9d   : > { %4376 = vst [vmem:[#allocation63_spill] sm:$0xff] %v3138_v7  ;;  %622 = vrot.lane.b32.xlu1 %v3131_v20, %s2492_s5 }
  0x9e   : > { %620 = vrot.lane.b32.xlu0 %v3136_v41, %s2492_s5 }
  0x9f   : > { %v3144_v49 = vpop.permute.xlu1 %397 }
  0xa0   : > { %v3146_v44 = vpop.permute.xlu0 %395 }
  0xa1   : > { %4377 = vst [vmem:[#allocation64_spill] sm:$0xff] %v3146_v44  ;;  %660 = vrot.lane.b32.xlu1 %v2588_v1, %s2493_s6 }
  0xa2   : > { %658 = vrot.lane.b32.xlu0 %v2585_v0, %s2493_s6 }
  0xa3   : > { %v3152_v33 = vpop.permute.xlu1 %401 }
  0xa4   : > { %v3154_v45 = vpop.permute.xlu0 %399 }
  0xa5   : > { %664 = vrot.lane.b32.xlu1 %v2608_v11, %s2493_s6 }
  0xa6   : > { %662 = vrot.lane.b32.xlu0 %v2618_v15, %s2493_s6 }
  0xa7   : > { %v3160_v9 = vpop.permute.xlu1 %405 }
  0xa8   : > { %v3162_v20 = vpop.permute.xlu0 %403 }
  0xa9   : > { %668 = vrot.lane.b32.xlu1 %v2632_v22, %s2493_s6 }
  0xaa   : > { %666 = vrot.lane.b32.xlu0 %v2638_v24, %s2493_s6 }
  0xab   : > { %v3168_v0 = vpop.permute.xlu1 %409 }
  0xac   : > { %v3170_v1 = vpop.permute.xlu0 %407 }
  0xad   : > { %672 = vrot.lane.b32.xlu1 %v2653_v30, %s2493_s6 }
  0xae   : > { %670 = vrot.lane.b32.xlu0 %v2659_v32, %s2493_s6 }
  0xaf   : > { %v3176_v41 = vpop.permute.xlu1 %413 }
  0xb0   : > { %v3178_v10 = vpop.permute.xlu0 %411 }
  0xb1   : > { %676 = vrot.lane.b32.xlu1 %v2675_v38, %s2493_s6 }
  0xb2   : > { %674 = vrot.lane.b32.xlu0 %v2681_v40, %s2493_s6 }
  0xb3   : > { %v3184_v61 = vpop.permute.xlu1 %417 }
  0xb4   : > { %v3186_v44 = vpop.permute.xlu0 %415 }
  0xb5   : > { %680 = vrot.lane.b32.xlu1 %v2697_v46, %s2493_s6 }
  0xb6   : > { %678 = vrot.lane.b32.xlu0 %v2703_v48, %s2493_s6 }
  0xb7   : > { %v3192_v21 = vpop.permute.xlu1 %421 }
  0xb8   : > { %v3194_v7 = vpop.permute.xlu0 %419 }
  0xb9   : > { %684 = vrot.lane.b32.xlu1 %v2719_v54, %s2493_s6 }
  0xba   : > { %682 = vrot.lane.b32.xlu0 %v2725_v56, %s2493_s6 }
  0xbb   : > { %v3200_v18 = vpop.permute.xlu1 %425 }
  0xbc   : > { %v3202_v29 = vpop.permute.xlu0 %423 }
  0xbd   : > { %688 = vrot.lane.b32.xlu1 %v2741_v62, %s2493_s6 }
  0xbe   : > { %686 = vrot.lane.b32.xlu0 %v2747_v3, %s2493_s6 }
  0xbf   : > { %v3208_v58 = vpop.permute.xlu1 %429 }
  0xc0   : > { %v3210_v63 = vpop.permute.xlu0 %427 }
  0xc1   : > { %692 = vrot.lane.b32.xlu1 %v2763_v16, %s2493_s6 }
  0xc2   : > { %690 = vrot.lane.b32.xlu0 %v2769_v19, %s2493_s6 }
  0xc3   : > { %v3216_v35 = vpop.permute.xlu1 %433 }
  0xc4   : > { %v3218_v4 = vpop.permute.xlu0 %431 }
  0xc5   : > { %696 = vrot.lane.b32.xlu1 %v2785_v34, %s2493_s6 }
  0xc6   : > { %694 = vrot.lane.b32.xlu0 %v2791_v37, %s2493_s6 }
  0xc7   : > { %v3224_v55 = vpop.permute.xlu1 %437 }
  0xc8   : > { %v3226_v47 = vpop.permute.xlu0 %435 }
  0xc9   : > { %700 = vrot.lane.b32.xlu1 %v2807_v53, %s2493_s6 }
  0xca   : > { %698 = vrot.lane.b32.xlu0 %v2813_v59, %s2493_s6 }
  0xcb   : > { %v3232_v6 = vpop.permute.xlu1 %441 }
  0xcc   : > { %v3234_v39 = vpop.permute.xlu0 %439 }
  0xcd   : > { %762 = vrot.lane.b32.xlu1 %v2625_v17, %s2494_s7  ;;  %v1524_v17 = vld [vmem:[%s4218_s1 + $0x10] sm:$0xff] }
  0xce   : > { %760 = vrot.lane.b32.xlu0 %v2611_v12, %s2494_s7  ;;  %v1525_v12 = vld [vmem:[%s4218_s1 + $0x18] sm:$0xff] }
  0xcf   : > { %v3243_v52 = vpop.permute.xlu1 %445  ;;  %2228 = vmatprep.subr.mxu0 %v1525_v12  ;;  %2285 = vmatprep.subr.mxu1 %v1525_v12 }
  0xd0   : > { %4378 = vst [vmem:[#allocation65_spill] sm:$0xff] %v3243_v52  ;;  %v3245_v60 = vpop.permute.xlu0 %443  ;;  %2229 = vmatpush3.msra.mxu0 %v1525_v12  ;;  %2290 = vmatpush3.msra.mxu1 %v1525_v12 }
  0xd1   : > { %863 = vrot.lane.b32.xlu1 %v2941_v2, %s2495_s10  ;;  %2230 = vmatprep.subr.mxu0 %v1524_v17  ;;  %v1522_v2 = vld [vmem:[%s4218_s1] sm:$0xff] }
  0xd2   : > { %861 = vrot.lane.b32.xlu0 %v2946_v51, %s2495_s10  ;;  %2231 = vmatpush3.msra.mxu0 %v1524_v17  ;;  %v1523_v51 = vld [vmem:[%s4218_s1 + $0x8] sm:$0xff] }
  0xd3   : > { %v3257_v52 = vpop.permute.xlu1 %562  ;;  %2232 = vmatprep.subr.mxu0 %v1523_v51  ;;  %2286 = vmatprep.subr.mxu1 %v1524_v17 }
  0xd4   : > { %4379 = vst [vmem:[#allocation66_spill] sm:$0xff] %v3257_v52  ;;  %v3259_v8 = vpop.permute.xlu0 %560  ;;  %2233 = vmatpush3.msra.mxu0 %v1523_v51  ;;  %2291 = vmatpush3.msra.mxu1 %v1524_v17 }
  0xd5   : > { %961 = vrot.lane.b32.xlu1 %v2608_v11, %s2496_s23  ;;  %2234 = vmatprep.subr.mxu0 %v1522_v2 }
  0xd6   : > { %959 = vrot.lane.b32.xlu0 %v2618_v15, %s2496_s23  ;;  %2235 = vmatpush3.msra.mxu0 %v1522_v2 }
  0xd7   : > { %v3271_v52 = vpop.permute.xlu1 %566  ;;  %2287 = vmatprep.subr.mxu1 %v1523_v51 }
  0xd8   : > { %v3273_v12 = vpop.permute.xlu0 %564  ;;  %2292 = vmatpush3.msra.mxu1 %v1523_v51 }
  0xd9   : > { %764 = vrot.lane.b32.xlu1 %v2649_v28, %s2494_s7  ;;  %2288 = vmatprep.subr.mxu1 %v1522_v2 }
  0xda   : > { %1061 = vrot.lane.b32.xlu0 %v2649_v28, %s2497_s4  ;;  %2293 = vmatpush3.msra.mxu1 %v1522_v2  ;;  %v1266_v28 = vsel %vm1258_vm3, %v2632_v22, %v3144_v49  ;;  %v1268_v2 = vsel %vm1258_vm3, %v2653_v30, %v3152_v33  ;;  %v1267_v49 = vsel %vm1258_vm3, %v2659_v32, %v3154_v45 }
  0xdb   : > { %v3279_v11 = vpop.permute.xlu1 %570  ;;  %v1269_v33 = vsel %vm1258_vm3, %v2681_v40, %v3162_v20  ;;  %v1271_v20 = vsel %vm1258_vm3, %v2703_v48, %v3170_v1 }
  0xdc   : > { %4380 = vst [vmem:[#allocation67_spill] sm:$0xff] %v3279_v11  ;;  %v3281_v15 = vpop.permute.xlu0 %568 }
  0xdd   : > { %4381 = vst [vmem:[#allocation68_spill] sm:$0xff] %v3281_v15  ;;  %1162 = vrot.lane.b32.xlu1 %v2959_v14, %s2498_s8 }
  0xde   : > { %1063 = vrot.lane.b32.xlu0 %v2644_v25, %s2497_s4 }
  0xdf   : > { %v575_v17 = vpop.permute.xlu1 %574 }
  0xe0   : > { %v3291_v51 = vsel %vm1291_vm4, %v1266_v28, %v575_v17  ;;  %v3293_v11 = vpop.permute.xlu0 %572 }
  0xe1   : > { %4382 = vst [vmem:[#allocation69_spill] sm:$0xff] %v3291_v51  ;;  %865 = vrot.lane.b32.xlu1 %v2959_v14, %s2495_s10 }
  0xe2   : > { %766 = vrot.lane.b32.xlu0 %v2644_v25, %s2494_s7  ;;  %v1270_v25 = vsel %vm1258_vm3, %v2675_v38, %v3160_v9 }
  0xe3   : > { %v579_v15 = vpop.permute.xlu1 %578 }
  0xe4   : > { %v3306_v28 = vsel %vm1291_vm4, %v1268_v2, %v579_v15  ;;  %v577_v17 = vpop.permute.xlu0 %576 }
  0xe5   : > { %v3309_v51 = vsel %vm1291_vm4, %v1267_v49, %v577_v17  ;;  %867 = vrot.lane.b32.xlu1 %v2954_v43, %s2495_s10 }
  0xe6   : > { %1164 = vrot.lane.b32.xlu0 %v2954_v43, %s2498_s8  ;;  %v1272_v43 = vsel %vm1258_vm3, %v2697_v46, %v3168_v0  ;;  %v1273_v0 = vsel %vm1258_vm3, %v2725_v56, %v3178_v10  ;;  %v1275_v10 = vsel %vm1258_vm3, %v2747_v3, %v3186_v44  ;;  %v1277_v44 = vsel %vm1258_vm3, %v2769_v19, %v3194_v7 }
  0xe7   : > { %v583_v14 = vpop.permute.xlu1 %582  ;;  %v1279_v7 = vsel %vm1258_vm3, %v2791_v37, %v3202_v29  ;;  %v1281_v37 = vsel %vm1258_vm3, %v2813_v59, %v3210_v63  ;;  %v1283_v59 = vsel %vm1258_vm3, %v2835_v42, %v3218_v4  ;;  %v1285_v42 = vsel %vm1258_vm3, %v2857_v13, %v3226_v47 }
  0xe8   : > { %v3322_v45 = vsel %vm1291_vm4, %v1270_v25, %v583_v14  ;;  %v581_v15 = vpop.permute.xlu0 %580  ;;  %v1287_v13 = vsel %vm1258_vm3, %v2879_v50, %v3234_v39  ;;  %v4391_v50 = vld [vmem:[#allocation30_spill] sm:$0xff] }
  0xe9   : > { %v3325_v2 = vsel %vm1291_vm4, %v1269_v33, %v581_v15  ;;  %965 = vrot.lane.b32.xlu1 %v2632_v22, %s2496_s23  ;;  %v1274_v22 = vsel %vm1258_vm3, %v2719_v54, %v3176_v41  ;;  %v1276_v41 = vsel %vm1258_vm3, %v2741_v62, %v3184_v61  ;;  %v1278_v61 = vsel %vm1258_vm3, %v2763_v16, %v3192_v21 }
  0xea   : > { %963 = vrot.lane.b32.xlu0 %v2638_v24, %s2496_s23  ;;  %v1289_v39 = vsel %vm1258_vm3, %v4391_v50, %v3245_v60 }
  0xeb   : > { %v587_v9 = vpop.permute.xlu1 %586 }
  0xec   : > { %v3338_v49 = vsel %vm1291_vm4, %v1272_v43, %v587_v9  ;;  %v585_v17 = vpop.permute.xlu0 %584 }
  0xed   : > { %v3341_v25 = vsel %vm1291_vm4, %v1271_v20, %v585_v17  ;;  %768 = vrot.lane.b32.xlu1 %v2671_v36, %s2494_s7 }
  0xee   : > { %1065 = vrot.lane.b32.xlu0 %v2671_v36, %s2497_s4  ;;  %v4383_v36 = vld [vmem:[#allocation8_spill] sm:$0xff] }
  0xef   : > { %v591_v24 = vpop.permute.xlu1 %590 }
  0xf0   : > { %v3354_v1 = vsel %vm1291_vm4, %v1274_v22, %v591_v24  ;;  %v589_v14 = vpop.permute.xlu0 %588 }
  0xf1   : > { %v3357_v33 = vsel %vm1291_vm4, %v1273_v0, %v589_v14  ;;  %1166 = vrot.lane.b32.xlu1 %v2972_v23, %s2498_s8 }
  0xf2   : > { %1067 = vrot.lane.b32.xlu0 %v4383_v36, %s2497_s4 }
  0xf3   : > { %v595_v15 = vpop.permute.xlu1 %594 }
  0xf4   : > { %v3370_v43 = vsel %vm1291_vm4, %v1276_v41, %v595_v15  ;;  %v593_v9 = vpop.permute.xlu0 %592 }
  0xf5   : > { %v3373_v20 = vsel %vm1291_vm4, %v1275_v10, %v593_v9  ;;  %869 = vrot.lane.b32.xlu1 %v2972_v23, %s2495_s10  ;;  %v1280_v23 = vsel %vm1258_vm3, %v2785_v34, %v3200_v18  ;;  %v1282_v34 = vsel %vm1258_vm3, %v2807_v53, %v3208_v58  ;;  %v4385_v9 = vld [vmem:[#allocation9_spill] sm:$0xff] }
  0xf6   : > { %770 = vrot.lane.b32.xlu0 %v4383_v36, %s2494_s7 }
  0xf7   : > { %v599_v17 = vpop.permute.xlu1 %598 }
  0xf8   : > { %v3386_v22 = vsel %vm1291_vm4, %v1278_v61, %v599_v17  ;;  %v597_v24 = vpop.permute.xlu0 %596 }
  0xf9   : > { %v3389_v0 = vsel %vm1291_vm4, %v1277_v44, %v597_v24  ;;  %871 = vrot.lane.b32.xlu1 %v2967_v5, %s2495_s10 }
  0xfa   : > { %1168 = vrot.lane.b32.xlu0 %v2967_v5, %s2498_s8 }
  0xfb   : > { %v603_v21 = vpop.permute.xlu1 %602 }
  0xfc   : > { %v3402_v14 = vsel %vm1291_vm4, %v1280_v23, %v603_v21  ;;  %v601_v36 = vpop.permute.xlu0 %600  ;;  %v4389_v23 = vld [vmem:[#allocation65_spill] sm:$0xff] }
  0xfd   : > { %v3405_v41 = vsel %vm1291_vm4, %v1279_v7, %v601_v36  ;;  %969 = vrot.lane.b32.xlu1 %v2653_v30, %s2496_s23  ;;  %v4384_v30 = vld [vmem:[#allocation10_spill] sm:$0xff] }
  0xfe   : > { %967 = vrot.lane.b32.xlu0 %v2659_v32, %s2496_s23  ;;  %v1284_v32 = vsel %vm1258_vm3, %v2829_v26, %v3216_v35  ;;  %v1286_v26 = vsel %vm1258_vm3, %v2851_v27, %v3224_v55  ;;  %v1288_v27 = vsel %vm1258_vm3, %v2873_v57, %v3232_v6  ;;  %v4390_v57 = vld [vmem:[#allocation29_spill] sm:$0xff] }
  0xff   : > { %v607_v5 = vpop.permute.xlu1 %606  ;;  %v1290_v6 = vsel %vm1258_vm3, %v4390_v57, %v4389_v23 }
 0x100   : > { %v3418_v18 = vsel %vm1291_vm4, %v1282_v34, %v607_v5  ;;  %v605_v29 = vpop.permute.xlu0 %604 }
 0x101   : > { %v3421_v15 = vsel %vm1291_vm4, %v1281_v37, %v605_v29  ;;  %772 = vrot.lane.b32.xlu1 %v4384_v30, %s2494_s7  ;;  %v4394_v29 = vld [vmem:[#allocation12_spill] sm:$0xff] }
 0x102   : > { %1069 = vrot.lane.b32.xlu0 %v4384_v30, %s2497_s4 }
 0x103   : > { %v611_v53 = vpop.permute.xlu1 %610 }
 0x104   : > { %v3434_v63 = vsel %vm1291_vm4, %v1284_v32, %v611_v53  ;;  %v609_v58 = vpop.permute.xlu0 %608  ;;  %v4395_v32 = vld [vmem:[#allocation37_spill] sm:$0xff] }
 0x105   : > { %v3437_v10 = vsel %vm1291_vm4, %v1283_v59, %v609_v58  ;;  %1170 = vrot.lane.b32.xlu1 %v2985_v31, %s2498_s8 }
 0x106   : > { %1071 = vrot.lane.b32.xlu0 %v4385_v9, %s2497_s4 }
 0x107   : > { %v615_v35 = vpop.permute.xlu1 %614 }
 0x108   : > { %v3450_v4 = vsel %vm1291_vm4, %v1286_v26, %v615_v35  ;;  %v613_v61 = vpop.permute.xlu0 %612 }
 0x109   : > { %v3453_v17 = vsel %vm1291_vm4, %v1285_v42, %v613_v61  ;;  %873 = vrot.lane.b32.xlu1 %v2985_v31, %s2495_s10  ;;  %v4388_v31 = vld [vmem:[#allocation35_spill] sm:$0xff] }
 0x10a   : > { %774 = vrot.lane.b32.xlu0 %v4385_v9, %s2494_s7  ;;  %v4397_v9 = vld [vmem:[#allocation36_spill] sm:$0xff] }
 0x10b   : > { %v619_v55 = vpop.permute.xlu1 %618 }
 0x10c   : > { %v3466_v47 = vsel %vm1291_vm4, %v1288_v27, %v619_v55  ;;  %v617_v44 = vpop.permute.xlu0 %616  ;;  %v4398_v27 = vld [vmem:[#allocation14_spill] sm:$0xff] }
 0x10d   : > { %4386 = vst [vmem:[#allocation8_spill] sm:$0xff] %v3466_v47  ;;  %v3469_v24 = vsel %vm1291_vm4, %v1287_v13, %v617_v44  ;;  %875 = vrot.lane.b32.xlu1 %v4388_v31, %s2495_s10  ;;  %v4399_v44 = vld [vmem:[#allocation39_spill] sm:$0xff] }
 0x10e   : > { %4387 = vst [vmem:[#allocation10_spill] sm:$0xff] %v3469_v24  ;;  %1172 = vrot.lane.b32.xlu0 %v4388_v31, %s2498_s8 }
 0x10f   : > { %v623_v21 = vpop.permute.xlu1 %622 }
 0x110   : > { %v3482_v7 = vsel %vm1291_vm4, %v1290_v6, %v623_v21  ;;  %v621_v36 = vpop.permute.xlu0 %620  ;;  %v4401_v6 = vld [vmem:[#allocation38_spill] sm:$0xff] }
 0x111   : > { %4392 = vst [vmem:[#allocation9_spill] sm:$0xff] %v3482_v7  ;;  %v3485_v34 = vsel %vm1291_vm4, %v1289_v39, %v621_v36  ;;  %973 = vrot.lane.b32.xlu1 %v2675_v38, %s2496_s23  ;;  %v4396_v38 = vld [vmem:[#allocation11_spill] sm:$0xff]  ;;  %v4406_v7 = vld [vmem:[#allocation40_spill] sm:$0xff] }
 0x112   : > { %4393 = vst [vmem:[#allocation35_spill] sm:$0xff] %v3485_v34  ;;  %971 = vrot.lane.b32.xlu0 %v2681_v40, %s2496_s23 }
 0x113   : > { %v3491_v5 = vpop.permute.xlu1 %660 }
 0x114   : > { %v659_v37 = vpop.permute.xlu0 %658 }
 0x115   : > { %776 = vrot.lane.b32.xlu1 %v4394_v29, %s2494_s7 }
 0x116   : > { %1073 = vrot.lane.b32.xlu0 %v4394_v29, %s2497_s4  ;;  %v4402_v29 = vld [vmem:[#allocation16_spill] sm:$0xff] }
 0x117   : > { %v3497_v60 = vpop.permute.xlu1 %664 }
 0x118   : > { %v3499_v30 = vpop.permute.xlu0 %662 }
 0x119   : > { %1174 = vrot.lane.b32.xlu1 %v4395_v32, %s2498_s8 }
 0x11a   : > { %1075 = vrot.lane.b32.xlu0 %v4396_v38, %s2497_s4 }
 0x11b   : > { %v3505_v40 = vpop.permute.xlu1 %668 }
 0x11c   : > { %v3507_v53 = vpop.permute.xlu0 %666 }
 0x11d   : > { %877 = vrot.lane.b32.xlu1 %v4395_v32, %s2495_s10 }
 0x11e   : > { %778 = vrot.lane.b32.xlu0 %v4396_v38, %s2494_s7 }
 0x11f   : > { %v3513_v59 = vpop.permute.xlu1 %672 }
 0x120   : > { %v3515_v58 = vpop.permute.xlu0 %670 }
 0x121   : > { %879 = vrot.lane.b32.xlu1 %v4397_v9, %s2495_s10 }
 0x122   : > { %1176 = vrot.lane.b32.xlu0 %v4397_v9, %s2498_s8  ;;  %v4403_v9 = vld [vmem:[#allocation41_spill] sm:$0xff] }
 0x123   : > { %v3521_v26 = vpop.permute.xlu1 %676 }
 0x124   : > { %v3523_v35 = vpop.permute.xlu0 %674 }
 0x125   : > { %977 = vrot.lane.b32.xlu1 %v2697_v46, %s2496_s23  ;;  %v4400_v46 = vld [vmem:[#allocation13_spill] sm:$0xff] }
 0x126   : > { %975 = vrot.lane.b32.xlu0 %v2703_v48, %s2496_s23 }
 0x127   : > { %v3529_v42 = vpop.permute.xlu1 %680 }
 0x128   : > { %v3531_v61 = vpop.permute.xlu0 %678 }
 0x129   : > { %780 = vrot.lane.b32.xlu1 %v4398_v27, %s2494_s7 }
 0x12a   : > { %1077 = vrot.lane.b32.xlu0 %v4398_v27, %s2497_s4 }
 0x12b   : > { %v3537_v55 = vpop.permute.xlu1 %684 }
 0x12c   : > { %v3539_v13 = vpop.permute.xlu0 %682 }
 0x12d   : > { %1178 = vrot.lane.b32.xlu1 %v4399_v44, %s2498_s8 }
 0x12e   : > { %1079 = vrot.lane.b32.xlu0 %v4400_v46, %s2497_s4 }
 0x12f   : > { %v3545_v48 = vpop.permute.xlu1 %688 }
 0x130   : > { %v3547_v31 = vpop.permute.xlu0 %686 }
 0x131   : > { %881 = vrot.lane.b32.xlu1 %v4399_v44, %s2495_s10 }
 0x132   : > { %782 = vrot.lane.b32.xlu0 %v4400_v46, %s2494_s7 }
 0x133   : > { %v3553_v23 = vpop.permute.xlu1 %692 }
 0x134   : > { %v3555_v57 = vpop.permute.xlu0 %690 }
 0x135   : > { %883 = vrot.lane.b32.xlu1 %v4401_v6, %s2495_s10 }
 0x136   : > { %1180 = vrot.lane.b32.xlu0 %v4401_v6, %s2498_s8  ;;  %v2364_v6 = vld [vmem:[%s2582_s30] sm:$0xff] }
 0x137   : > { %v3561_v21 = vpop.permute.xlu1 %696 }
 0x138   : > { %v3563_v50 = vpop.permute.xlu0 %694 }
 0x139   : > { %981 = vrot.lane.b32.xlu1 %v2719_v54, %s2496_s23  ;;  %v4404_v54 = vld [vmem:[#allocation15_spill] sm:$0xff] }
 0x13a   : > { %979 = vrot.lane.b32.xlu0 %v2725_v56, %s2496_s23 }
 0x13b   : > { %v3569_v39 = vpop.permute.xlu1 %700 }
 0x13c   : > { %v3571_v36 = vpop.permute.xlu0 %698 }
 0x13d   : > { %784 = vrot.lane.b32.xlu1 %v4402_v29, %s2494_s7 }
 0x13e   : > { %1081 = vrot.lane.b32.xlu0 %v4402_v29, %s2497_s4  ;;  %v4405_v29 = vld [vmem:[#allocation55_spill] sm:$0xff] }
 0x13f   : > { %v763_v32 = vpop.permute.xlu1 %762  ;;  %v1259_v34 = vsel %vm1258_vm3, %v2364_v6, %v4405_v29 }
 0x140   : > { %v761_v38 = vpop.permute.xlu0 %760  ;;  %v1292_v47 = vsel %vm1291_vm4, %v1259_v34, %v3259_v8 }
 0x141   : > { %1182 = vrot.lane.b32.xlu1 %v4403_v9, %s2498_s8 }
 0x142   : > { %1083 = vrot.lane.b32.xlu0 %v4404_v54, %s2497_s4 }
 0x143   : > { %v864_v56 = vpop.permute.xlu1 %863 }
 0x144   : > { %v862_v27 = vpop.permute.xlu0 %861 }
 0x145   : > { %885 = vrot.lane.b32.xlu1 %v4403_v9, %s2495_s10  ;;  %v1325_v9 = vsel %vm1324_vm5, %v1292_v47, %v659_v37 }
 0x146   : > { %786 = vrot.lane.b32.xlu0 %v4404_v54, %s2494_s7  ;;  %v1358_v24 = vsel %vm1357_vm6, %v1325_v9, %v761_v38  ;;  %v4407_v38 = vld [vmem:[#allocation18_spill] sm:$0xff] }
 0x147   : > { %v962_v44 = vpop.permute.xlu1 %961  ;;  %v1391_v29 = vsel %vm1390_vm7, %v1358_v24, %v862_v27  ;;  %v2365_v24 = vld [vmem:[%s2582_s30 + $0x8] sm:$0xff] }
 0x148   : > { %v960_v46 = vpop.permute.xlu0 %959 }
 0x149   : > { %887 = vrot.lane.b32.xlu1 %v4406_v7, %s2495_s10  ;;  %v1424_v8 = vsel %vm1423_vm8, %v1391_v29, %v960_v46 }
 0x14a   : > { %1184 = vrot.lane.b32.xlu0 %v4406_v7, %s2498_s8 }
 0x14b   : > { %v765_v54 = vpop.permute.xlu1 %764 }
 0x14c   : > { %v1062_v6 = vpop.permute.xlu0 %1061 }
 0x14d   : > { %985 = vrot.lane.b32.xlu1 %v2741_v62, %s2496_s23  ;;  %v1457_v47 = vsel %vm1456_vm9, %v1424_v8, %v1062_v6  ;;  %v4408_v62 = vld [vmem:[#allocation59_spill] sm:$0xff] }
 0x14e   : > { %983 = vrot.lane.b32.xlu0 %v2747_v3, %s2496_s23  ;;  %v1260_v27 = vsel %vm1258_vm3, %v2365_v24, %v4408_v62  ;;  %v4409_v3 = vld [vmem:[#allocation66_spill] sm:$0xff] }
 0x14f   : > { %v1163_v7 = vpop.permute.xlu1 %1162  ;;  %v1293_v46 = vsel %vm1291_vm4, %v1260_v27, %v4409_v3  ;;  %v2366_v3 = vld [vmem:[%s2582_s30 + $0x18] sm:$0xff] }
 0x150   : > { %v1064_v34 = vpop.permute.xlu0 %1063  ;;  %v1490_v37 = vsel %vm1489_vm10, %v1457_v47, %v1163_v7  ;;  %v1326_v6 = vsel %vm1324_vm5, %v1293_v46, %v3491_v5  ;;  %v4410_v47 = vld [vmem:[#allocation43_spill] sm:$0xff]  ;;  %v4412_v46 = vld [vmem:[#allocation53_spill] sm:$0xff] }
 0x151   : > { %788 = vrot.lane.b32.xlu1 %v4407_v38, %s2494_s7  ;;  %2236 = vmatprep.mubr.msk.f32.mxu0 %vm1527_vm11, %v1490_v37  ;;  %v1359_v8 = vsel %vm1357_vm6, %v1326_v6, %v763_v32  ;;  %v4411_v37 = vld [vmem:[#allocation17_spill] sm:$0xff]  ;;  %v4413_v6 = vld [vmem:[#allocation42_spill] sm:$0xff] }
 0x152   : > { %1085 = vrot.lane.b32.xlu0 %v4407_v38, %s2497_s4  ;;  %v1392_v7 = vsel %vm1390_vm7, %v1359_v8, %v864_v56 }
 0x153   : > { %v866_v9 = vpop.permute.xlu1 %865  ;;  %v1425_v38 = vsel %vm1423_vm8, %v1392_v7, %v962_v44  ;;  %v1261_v44 = vsel %vm1258_vm3, %v2366_v3, %v4412_v46  ;;  %v4414_v3 = vld [vmem:[#allocation20_spill] sm:$0xff] }
 0x154   : > { %v767_v29 = vpop.permute.xlu0 %766  ;;  %v1458_v62 = vsel %vm1456_vm9, %v1425_v38, %v1064_v34  ;;  %v1294_v34 = vsel %vm1291_vm4, %v1261_v44, %v3273_v12 }
 0x155   : > { %1186 = vrot.lane.b32.xlu1 %v4410_v47, %s2498_s8  ;;  %v1327_v8 = vsel %vm1324_vm5, %v1294_v34, %v3499_v30  ;;  %v4416_v34 = vld [vmem:[#allocation45_spill] sm:$0xff] }
 0x156   : > { %1087 = vrot.lane.b32.xlu0 %v4411_v37, %s2497_s4  ;;  %v1360_v7 = vsel %vm1357_vm6, %v1327_v8, %v765_v54  ;;  %v2367_v54 = vld [vmem:[%s2582_s30 + $0x20] sm:$0xff] }
 0x157   : > { %v868_v24 = vpop.permute.xlu1 %867  ;;  %v1393_v38 = vsel %vm1390_vm7, %v1360_v7, %v866_v9  ;;  %v4415_v9 = vld [vmem:[#allocation57_spill] sm:$0xff]  ;;  %v4417_v7 = vld [vmem:[#allocation19_spill] sm:$0xff] }
 0x158   : > { %v1165_v27 = vpop.permute.xlu0 %1164 }
 0x159   : > { %v1491_v5 = vsel %vm1489_vm10, %v1458_v62, %v1165_v27  ;;  %889 = vrot.lane.b32.xlu1 %v4410_v47, %s2495_s10 }
 0x15a   : > { %790 = vrot.lane.b32.xlu0 %v4411_v37, %s2494_s7  ;;  %2237 = vmatmul.mubr.msk.f32.vlgmr.msra.gmra.mxu0 %vm1527_vm11, %v1491_v5 }
 0x15b   : > { %v966_v32 = vpop.permute.xlu1 %965 }
 0x15c   : > { %v964_v56 = vpop.permute.xlu0 %963 }
 0x15d   : > { %891 = vrot.lane.b32.xlu1 %v4413_v6, %s2495_s10  ;;  %v1426_v62 = vsel %vm1423_vm8, %v1393_v38, %v964_v56 }
 0x15e   : > { %1188 = vrot.lane.b32.xlu0 %v4413_v6, %s2498_s8 }
 0x15f   : > { %v769_v47 = vpop.permute.xlu1 %768 }
 0x160   : > { %v1066_v37 = vpop.permute.xlu0 %1065 }
 0x161   : > { %989 = vrot.lane.b32.xlu1 %v2763_v16, %s2496_s23  ;;  %v1459_v12 = vsel %vm1456_vm9, %v1426_v62, %v1066_v37  ;;  %v1262_v16 = vsel %vm1258_vm3, %v2367_v54, %v4415_v9 }
 0x162   : > { %987 = vrot.lane.b32.xlu0 %v2769_v19, %s2496_s23  ;;  %v1295_v19 = vsel %vm1291_vm4, %v1262_v16, %v3271_v52 }
 0x163   : > { %v1167_v27 = vpop.permute.xlu1 %1166  ;;  %v1328_v46 = vsel %vm1324_vm5, %v1295_v19, %v3497_v60 }
 0x164   : > { %v1492_v5 = vsel %vm1489_vm10, %v1459_v12, %v1167_v27  ;;  %v1068_v30 = vpop.permute.xlu0 %1067  ;;  %v1361_v6 = vsel %vm1357_vm6, %v1328_v46, %v767_v29  ;;  %v2368_v12 = vld [vmem:[%s2582_s30 + $0x30] sm:$0xff] }
 0x165   : > { %792 = vrot.lane.b32.xlu1 %v4414_v3, %s2494_s7  ;;  %2239 = vmatprep.mubr.msk.f32.mxu0 %vm1527_vm11, %v1492_v5  ;;  %v1394_v8 = vsel %vm1390_vm7, %v1361_v6, %v868_v24  ;;  %v4419_v5 = vld [vmem:[#allocation44_spill] sm:$0xff]  ;;  %v2369_v6 = vld [vmem:[%s2582_s30 + $0xf8] sm:$0xff] }
 0x166   : > { %1089 = vrot.lane.b32.xlu0 %v4414_v3, %s2497_s4  ;;  %v1427_v37 = vsel %vm1423_vm8, %v1394_v8, %v966_v32  ;;  %v4418_v32 = vld [vmem:[#allocation63_spill] sm:$0xff]  ;;  %v2370_v8 = vld [vmem:[%s2582_s30 + $0xf0] sm:$0xff] }
 0x167   : > { %v870_v56 = vpop.permute.xlu1 %869  ;;  %v1460_v52 = vsel %vm1456_vm9, %v1427_v37, %v1068_v30  ;;  %v1263_v27 = vsel %vm1258_vm3, %v2368_v12, %v4418_v32  ;;  %v4420_v30 = vld [vmem:[#allocation68_spill] sm:$0xff] }
 0x168   : > { %v771_v44 = vpop.permute.xlu0 %770  ;;  %v1296_v3 = vsel %vm1291_vm4, %v1263_v27, %v4420_v30 }
 0x169   : > { %1190 = vrot.lane.b32.xlu1 %v4416_v34, %s2498_s8  ;;  %v1329_v54 = vsel %vm1324_vm5, %v1296_v3, %v3507_v53  ;;  %v4424_v3 = vld [vmem:[#allocation47_spill] sm:$0xff] }
 0x16a   : > { %1091 = vrot.lane.b32.xlu0 %v4417_v7, %s2497_s4  ;;  %v1362_v16 = vsel %vm1357_vm6, %v1329_v54, %v769_v47  ;;  %v2371_v47 = vld [vmem:[%s2582_s30 + $0x38] sm:$0xff] }
 0x16b   : > { %v872_v38 = vpop.permute.xlu1 %871  ;;  %v1395_v46 = vsel %vm1390_vm7, %v1362_v16, %v870_v56  ;;  %v4422_v56 = vld [vmem:[#allocation61_spill] sm:$0xff] }
 0x16c   : > { %v1169_v62 = vpop.permute.xlu0 %1168  ;;  %v4425_v16 = vld [vmem:[#allocation21_spill] sm:$0xff] }
 0x16d   : > { %v1493_v60 = vsel %vm1489_vm10, %v1460_v52, %v1169_v62  ;;  %893 = vrot.lane.b32.xlu1 %v4416_v34, %s2495_s10  ;;  %v4421_v62 = vld [vmem:[#allocation22_spill] sm:$0xff] }
 0x16e   : > { %794 = vrot.lane.b32.xlu0 %v4417_v7, %s2494_s7  ;;  %2240 = vmatmul.mubr.msk.f32.gmra.mxu0 %vm1527_vm11, %v1493_v60  ;;  %v1264_v60 = vsel %vm1258_vm3, %v2371_v47, %v4422_v56 }
 0x16f   : > { %v970_v29 = vpop.permute.xlu1 %969 }
 0x170   : > { %v968_v24 = vpop.permute.xlu0 %967 }
 0x171   : > { %895 = vrot.lane.b32.xlu1 %v4419_v5, %s2495_s10  ;;  %v1428_v34 = vsel %vm1423_vm8, %v1395_v46, %v968_v24  ;;  %v4423_v24 = vld [vmem:[#allocation67_spill] sm:$0xff] }
 0x172   : > { %1192 = vrot.lane.b32.xlu0 %v4419_v5, %s2498_s8  ;;  %v1297_v12 = vsel %vm1291_vm4, %v1264_v60, %v4423_v24  ;;  %v2373_v24 = vld [vmem:[%s2582_s30 + $0x110] sm:$0xff] }
 0x173   : > { %v773_v9 = vpop.permute.xlu1 %772  ;;  %v1330_v27 = vsel %vm1324_vm5, %v1297_v12, %v3505_v40 }
 0x174   : > { %v1070_v19 = vpop.permute.xlu0 %1069  ;;  %v1363_v30 = vsel %vm1357_vm6, %v1330_v27, %v771_v44  ;;  %v2374_v27 = vld [vmem:[%s2582_s30 + $0x108] sm:$0xff] }
 0x175   : > { %993 = vrot.lane.b32.xlu1 %v2369_v6, %s2496_s23  ;;  %v1461_v7 = vsel %vm1456_vm9, %v1428_v34, %v1070_v19  ;;  %v1396_v54 = vsel %vm1390_vm7, %v1363_v30, %v872_v38 }
 0x176   : > { %991 = vrot.lane.b32.xlu0 %v2370_v8, %s2496_s23  ;;  %v1429_v19 = vsel %vm1423_vm8, %v1396_v54, %v970_v29  ;;  %v2372_v8 = vld [vmem:[%s2582_s30 + $0x48] sm:$0xff]  ;;  %v4426_v29 = vld [vmem:[#allocation64_spill] sm:$0xff] }
 0x177   : > { %v1171_v37 = vpop.permute.xlu1 %1170  ;;  %v4428_v54 = vld [vmem:[#allocation24_spill] sm:$0xff] }
 0x178   : > { %v1494_v53 = vsel %vm1489_vm10, %v1461_v7, %v1171_v37  ;;  %v1072_v52 = vpop.permute.xlu0 %1071  ;;  %v1265_v7 = vsel %vm1258_vm3, %v2372_v8, %v4426_v29  ;;  %v4427_v37 = vld [vmem:[#allocation46_spill] sm:$0xff] }
 0x179   : > { %796 = vrot.lane.b32.xlu1 %v4421_v62, %s2494_s7  ;;  %2242 = vmatprep.mubr.msk.f32.mxu0 %vm1527_vm11, %v1494_v53  ;;  %v1462_v6 = vsel %vm1456_vm9, %v1429_v19, %v1072_v52  ;;  %v1298_v53 = vsel %vm1291_vm4, %v1265_v7, %v3293_v11 }
 0x17a   : > { %1093 = vrot.lane.b32.xlu0 %v4421_v62, %s2497_s4  ;;  %v1331_v52 = vsel %vm1324_vm5, %v1298_v53, %v3515_v58  ;;  %v4432_v53 = vld [vmem:[#allocation48_spill] sm:$0xff] }
 0x17b   : > { %v874_v32 = vpop.permute.xlu1 %873  ;;  %v1364_v47 = vsel %vm1357_vm6, %v1331_v52, %v773_v9 }
 0x17c   : > { %v775_v5 = vpop.permute.xlu0 %774  ;;  %v1397_v60 = vsel %vm1390_vm7, %v1364_v47, %v874_v32  ;;  %v4429_v32 = vld [vmem:[#allocation69_spill] sm:$0xff] }
 0x17d   : > { %1194 = vrot.lane.b32.xlu1 %v4424_v3, %s2498_s8 }
 0x17e   : > { %1095 = vrot.lane.b32.xlu0 %v4425_v16, %s2497_s4 }
 0x17f   : > { %v876_v46 = vpop.permute.xlu1 %875 }
 0x180   : > { %v1173_v34 = vpop.permute.xlu0 %1172 }
 0x181   : > { %v1495_v40 = vsel %vm1489_vm10, %v1462_v6, %v1173_v34  ;;  %897 = vrot.lane.b32.xlu1 %v4424_v3, %s2495_s10  ;;  %v4430_v34 = vld [vmem:[#allocation49_spill] sm:$0xff] }
 0x182   : > { %798 = vrot.lane.b32.xlu0 %v4425_v16, %s2494_s7  ;;  %2243 = vmatmul.mubr.msk.f32.gmra.mxu0 %vm1527_vm11, %v1495_v40  ;;  %v1332_v16 = vsel %vm1324_vm5, %v4429_v32, %v3513_v59 }
 0x183   : > { %v974_v44 = vpop.permute.xlu1 %973  ;;  %v1365_v6 = vsel %vm1357_vm6, %v1332_v16, %v775_v5 }
 0x184   : > { %v972_v38 = vpop.permute.xlu0 %971  ;;  %v1398_v40 = vsel %vm1390_vm7, %v1365_v6, %v876_v46 }
 0x185   : > { %899 = vrot.lane.b32.xlu1 %v4427_v37, %s2495_s10  ;;  %v1430_v12 = vsel %vm1423_vm8, %v1397_v60, %v972_v38  ;;  %v4431_v38 = vld [vmem:[#allocation23_spill] sm:$0xff]  ;;  %v1431_v8 = vsel %vm1423_vm8, %v1398_v40, %v974_v44  ;;  %v1333_v44 = vsel %vm1324_vm5, %v3309_v51, %v3523_v35  ;;  %v4433_v51 = vld [vmem:[#allocation26_spill] sm:$0xff] }
 0x186   : > { %1196 = vrot.lane.b32.xlu0 %v4427_v37, %s2498_s8  ;;  %v2376_v35 = vld [vmem:[%s2582_s30 + $0x128] sm:$0xff] }
 0x187   : > { %v777_v62 = vpop.permute.xlu1 %776 }
 0x188   : > { %v1074_v56 = vpop.permute.xlu0 %1073  ;;  %v1366_v47 = vsel %vm1357_vm6, %v1333_v44, %v777_v62 }
 0x189   : > { %997 = vrot.lane.b32.xlu1 %v2373_v24, %s2496_s23  ;;  %v1463_v11 = vsel %vm1456_vm9, %v1430_v12, %v1074_v56  ;;  %v2375_v24 = vld [vmem:[%s2582_s30 + $0x120] sm:$0xff] }
 0x18a   : > { %995 = vrot.lane.b32.xlu0 %v2374_v27, %s2496_s23 }
 0x18b   : > { %v1175_v30 = vpop.permute.xlu1 %1174 }
 0x18c   : > { %v1496_v3 = vsel %vm1489_vm10, %v1463_v11, %v1175_v30  ;;  %v1076_v58 = vpop.permute.xlu0 %1075 }
 0x18d   : > { %800 = vrot.lane.b32.xlu1 %v4428_v54, %s2494_s7  ;;  %2245 = vmatprep.mubr.msk.f32.mxu0 %vm1527_vm11, %v1496_v3  ;;  %v1464_v7 = vsel %vm1456_vm9, %v1431_v8, %v1076_v58  ;;  %v1334_v58 = vsel %vm1324_vm5, %v3306_v28, %v3521_v26  ;;  %v4434_v28 = vld [vmem:[#allocation51_spill] sm:$0xff]  ;;  %v4435_v26 = vld [vmem:[#allocation25_spill] sm:$0xff] }
 0x18e   : > { %1097 = vrot.lane.b32.xlu0 %v4428_v54, %s2497_s4 }
 0x18f   : > { %v878_v9 = vpop.permute.xlu1 %877 }
 0x190   : > { %v779_v19 = vpop.permute.xlu0 %778  ;;  %v1399_v60 = vsel %vm1390_vm7, %v1366_v47, %v878_v9 }
 0x191   : > { %1198 = vrot.lane.b32.xlu1 %v4430_v34, %s2498_s8  ;;  %v1367_v9 = vsel %vm1357_vm6, %v1334_v58, %v779_v19 }
 0x192   : > { %1099 = vrot.lane.b32.xlu0 %v4431_v38, %s2497_s4 }
 0x193   : > { %v880_v29 = vpop.permute.xlu1 %879 }
 0x194   : > { %v1177_v37 = vpop.permute.xlu0 %1176  ;;  %v1400_v32 = vsel %vm1390_vm7, %v1367_v9, %v880_v29  ;;  %v1335_v29 = vsel %vm1324_vm5, %v3325_v2, %v3531_v61  ;;  %v4439_v9 = vld [vmem:[#allocation27_spill] sm:$0xff] }
 0x195   : > { %v1497_v59 = vsel %vm1489_vm10, %v1464_v7, %v1177_v37  ;;  %901 = vrot.lane.b32.xlu1 %v4430_v34, %s2495_s10 }
 0x196   : > { %802 = vrot.lane.b32.xlu0 %v4431_v38, %s2494_s7  ;;  %2246 = vmatmul.mubr.msk.f32.gmra.mxu0 %vm1527_vm11, %v1497_v59 }
 0x197   : > { %v978_v5 = vpop.permute.xlu1 %977 }
 0x198   : > { %v976_v46 = vpop.permute.xlu0 %975  ;;  %v1433_v16 = vsel %vm1423_vm8, %v1400_v32, %v978_v5  ;;  %v1337_v32 = vsel %vm1324_vm5, %v3341_v25, %v3539_v13 }
 0x199   : > { %903 = vrot.lane.b32.xlu1 %v4432_v53, %s2495_s10  ;;  %v1432_v12 = vsel %vm1423_vm8, %v1399_v60, %v976_v46  ;;  %v4436_v46 = vld [vmem:[#allocation50_spill] sm:$0xff]  ;;  %v1336_v60 = vsel %vm1324_vm5, %v3322_v45, %v3529_v42 }
 0x19a   : > { %1200 = vrot.lane.b32.xlu0 %v4432_v53, %s2498_s8 }
 0x19b   : > { %v781_v52 = vpop.permute.xlu1 %780 }
 0x19c   : > { %v1078_v56 = vpop.permute.xlu0 %1077  ;;  %v1368_v37 = vsel %vm1357_vm6, %v1335_v29, %v781_v52  ;;  %v1338_v29 = vsel %vm1324_vm5, %v3338_v49, %v3537_v55  ;;  %v4441_v49 = vld [vmem:[#allocation32_spill] sm:$0xff]  ;;  %v2380_v55 = vld [vmem:[%s2582_s30 + $0x158] sm:$0xff] }
 0x19d   : > { %702 = vrot.lane.b32.xlu1 %v2375_v24, %s2493_s6  ;;  %v1465_v27 = vsel %vm1456_vm9, %v1432_v12, %v1078_v56  ;;  %v2377_v56 = vld [vmem:[%s2582_s30 + $0x138] sm:$0xff] }
 0x19e   : > { %999 = vrot.lane.b32.xlu0 %v2375_v24, %s2496_s23 }
 0x19f   : > { %v1179_v11 = vpop.permute.xlu1 %1178 }
 0x1a0   : > { %v1498_v30 = vsel %vm1489_vm10, %v1465_v27, %v1179_v11  ;;  %v1080_v3 = vpop.permute.xlu0 %1079  ;;  %v4437_v27 = vld [vmem:[#allocation28_spill] sm:$0xff] }
 0x1a1   : > { %1101 = vrot.lane.b32.xlu1 %v4433_v51, %s2497_s4  ;;  %2248 = vmatprep.mubr.msk.f32.mxu0 %vm1527_vm11, %v1498_v30  ;;  %v1466_v34 = vsel %vm1456_vm9, %v1433_v16, %v1080_v3  ;;  %v2378_v30 = vld [vmem:[%s2582_s30 + $0x140] sm:$0xff] }
 0x1a2   : > { %1001 = vrot.lane.b32.xlu0 %v2376_v35, %s2496_s23 }
 0x1a3   : > { %v882_v62 = vpop.permute.xlu1 %881 }
 0x1a4   : > { %v783_v54 = vpop.permute.xlu0 %782  ;;  %v1401_v5 = vsel %vm1390_vm7, %v1368_v37, %v882_v62 }
 0x1a5   : > { %804 = vrot.lane.b32.xlu1 %v4433_v51, %s2494_s7  ;;  %v1369_v12 = vsel %vm1357_vm6, %v1336_v60, %v783_v54  ;;  %v4438_v54 = vld [vmem:[#allocation54_spill] sm:$0xff] }
 0x1a6   : > { %704 = vrot.lane.b32.xlu0 %v2376_v35, %s2493_s6 }
 0x1a7   : > { %v884_v6 = vpop.permute.xlu1 %883 }
 0x1a8   : > { %v1181_v40 = vpop.permute.xlu0 %1180  ;;  %v1402_v11 = vsel %vm1390_vm7, %v1369_v12, %v884_v6 }
 0x1a9   : > { %v1499_v38 = vsel %vm1489_vm10, %v1466_v34, %v1181_v40  ;;  %1202 = vrot.lane.b32.xlu1 %v4434_v28, %s2498_s8 }
 0x1aa   : > { %1103 = vrot.lane.b32.xlu0 %v4435_v26, %s2497_s4  ;;  %2249 = vmatmul.mubr.msk.f32.gmra.mxu0 %vm1527_vm11, %v1499_v38 }
 0x1ab   : > { %v982_v19 = vpop.permute.xlu1 %981 }
 0x1ac   : > { %v980_v8 = vpop.permute.xlu0 %979  ;;  %v1435_v3 = vsel %vm1423_vm8, %v1402_v11, %v982_v19  ;;  %v4440_v19 = vld [vmem:[#allocation52_spill] sm:$0xff]  ;;  %v4442_v11 = vld [vmem:[#allocation58_spill] sm:$0xff] }
 0x1ad   : > { %905 = vrot.lane.b32.xlu1 %v4434_v28, %s2495_s10  ;;  %v1434_v53 = vsel %vm1423_vm8, %v1401_v5, %v980_v8 }
 0x1ae   : > { %806 = vrot.lane.b32.xlu0 %v4435_v26, %s2494_s7 }
 0x1af   : > { %v785_v7 = vpop.permute.xlu1 %784 }
 0x1b0   : > { %v1082_v59 = vpop.permute.xlu0 %1081  ;;  %v1370_v6 = vsel %vm1357_vm6, %v1337_v32, %v785_v7 }
 0x1b1   : > { %907 = vrot.lane.b32.xlu1 %v4436_v46, %s2495_s10  ;;  %v1467_v44 = vsel %vm1456_vm9, %v1434_v53, %v1082_v59  ;;  %v2379_v59 = vld [vmem:[%s2582_s30 + $0x150] sm:$0xff] }
 0x1b2   : > { %1204 = vrot.lane.b32.xlu0 %v4436_v46, %s2498_s8 }
 0x1b3   : > { %v1183_v47 = vpop.permute.xlu1 %1182 }
 0x1b4   : > { %v1500_v2 = vsel %vm1489_vm10, %v1467_v44, %v1183_v47  ;;  %v1084_v61 = vpop.permute.xlu0 %1083 }
 0x1b5   : > { %706 = vrot.lane.b32.xlu1 %v2377_v56, %s2493_s6  ;;  %2251 = vmatprep.mubr.msk.f32.mxu0 %vm1527_vm11, %v1500_v2  ;;  %v1468_v35 = vsel %vm1456_vm9, %v1435_v3, %v1084_v61  ;;  %v4443_v3 = vld [vmem:[#allocation31_spill] sm:$0xff] }
 0x1b6   : > { %1003 = vrot.lane.b32.xlu0 %v2377_v56, %s2496_s23 }
 0x1b7   : > { %v886_v52 = vpop.permute.xlu1 %885 }
 0x1b8   : > { %v787_v24 = vpop.permute.xlu0 %786  ;;  %v1403_v40 = vsel %vm1390_vm7, %v1370_v6, %v886_v52  ;;  %v1339_v52 = vsel %vm1324_vm5, %v3357_v33, %v3547_v31 }
 0x1b9   : > { %1105 = vrot.lane.b32.xlu1 %v4437_v27, %s2497_s4  ;;  %v1371_v37 = vsel %vm1357_vm6, %v1338_v29, %v787_v24 }
 0x1ba   : > { %1005 = vrot.lane.b32.xlu0 %v2378_v30, %s2496_s23 }
 0x1bb   : > { %v888_v51 = vpop.permute.xlu1 %887 }
 0x1bc   : > { %v1185_v62 = vpop.permute.xlu0 %1184  ;;  %v1404_v5 = vsel %vm1390_vm7, %v1371_v37, %v888_v51 }
 0x1bd   : > { %v1501_v58 = vsel %vm1489_vm10, %v1468_v35, %v1185_v62  ;;  %808 = vrot.lane.b32.xlu1 %v4437_v27, %s2494_s7 }
 0x1be   : > { %708 = vrot.lane.b32.xlu0 %v2378_v30, %s2493_s6  ;;  %2252 = vmatmul.mubr.msk.f32.gmra.mxu0 %vm1527_vm11, %v1501_v58  ;;  %v1340_v58 = vsel %vm1324_vm5, %v3354_v1, %v3545_v48  ;;  %v2381_v48 = vld [vmem:[%s2582_s30 + $0x168] sm:$0xff] }
 0x1bf   : > { %v986_v45 = vpop.permute.xlu1 %985 }
 0x1c0   : > { %v984_v42 = vpop.permute.xlu0 %983  ;;  %v1437_v46 = vsel %vm1423_vm8, %v1404_v5, %v986_v45 }
 0x1c1   : > { %1206 = vrot.lane.b32.xlu1 %v4438_v54, %s2498_s8  ;;  %v1436_v38 = vsel %vm1423_vm8, %v1403_v40, %v984_v42 }
 0x1c2   : > { %1107 = vrot.lane.b32.xlu0 %v4439_v9, %s2497_s4 }
 0x1c3   : > { %v789_v16 = vpop.permute.xlu1 %788 }
 0x1c4   : > { %v1086_v34 = vpop.permute.xlu0 %1085  ;;  %v1372_v24 = vsel %vm1357_vm6, %v1339_v52, %v789_v16  ;;  %v249_v52 = vld [vmem:[%s2582_s30 + $0x188] sm:$0xff] }
 0x1c5   : > { %909 = vrot.lane.b32.xlu1 %v4438_v54, %s2495_s10  ;;  %v1469_v28 = vsel %vm1456_vm9, %v1436_v38, %v1086_v34  ;;  %v4444_v54 = vld [vmem:[#allocation56_spill] sm:$0xff] }
 0x1c6   : > { %810 = vrot.lane.b32.xlu0 %v4439_v9, %s2494_s7 }
 0x1c7   : > { %v1187_v26 = vpop.permute.xlu1 %1186 }
 0x1c8   : > { %v1502_v25 = vsel %vm1489_vm10, %v1469_v28, %v1187_v26  ;;  %v1088_v13 = vpop.permute.xlu0 %1087  ;;  %v4445_v28 = vld [vmem:[#allocation34_spill] sm:$0xff]  ;;  %v2382_v26 = vld [vmem:[%s2582_s30 + $0x170] sm:$0xff] }
 0x1c9   : > { %911 = vrot.lane.b32.xlu1 %v4440_v19, %s2495_s10  ;;  %2254 = vmatprep.mubr.msk.f32.mxu0 %vm1527_vm11, %v1502_v25  ;;  %v1470_v44 = vsel %vm1456_vm9, %v1437_v46, %v1088_v13  ;;  %v1341_v25 = vsel %vm1324_vm5, %v3373_v20, %v3555_v57  ;;  %v4446_v57 = vld [vmem:[#allocation62_spill] sm:$0xff]  ;;  %v4447_v46 = vld [vmem:[#allocation33_spill] sm:$0xff] }
 0x1ca   : > { %1208 = vrot.lane.b32.xlu0 %v4440_v19, %s2498_s8 }
 0x1cb   : > { %v890_v8 = vpop.permute.xlu1 %889 }
 0x1cc   : > { %v791_v7 = vpop.permute.xlu0 %790  ;;  %v1405_v27 = vsel %vm1390_vm7, %v1372_v24, %v890_v8 }
 0x1cd   : > { %710 = vrot.lane.b32.xlu1 %v2379_v59, %s2493_s6  ;;  %v1373_v42 = vsel %vm1357_vm6, %v1340_v58, %v791_v7 }
 0x1ce   : > { %1007 = vrot.lane.b32.xlu0 %v2379_v59, %s2496_s23 }
 0x1cf   : > { %v892_v53 = vpop.permute.xlu1 %891 }
 0x1d0   : > { %v1189_v47 = vpop.permute.xlu0 %1188  ;;  %v1406_v9 = vsel %vm1390_vm7, %v1373_v42, %v892_v53 }
 0x1d1   : > { %v1503_v2 = vsel %vm1489_vm10, %v1470_v44, %v1189_v47  ;;  %1109 = vrot.lane.b32.xlu1 %v4441_v49, %s2497_s4  ;;  %v1342_v44 = vsel %vm1324_vm5, %v3370_v43, %v3553_v23  ;;  %v4448_v23 = vld [vmem:[#allocation60_spill] sm:$0xff] }
 0x1d2   : > { %1009 = vrot.lane.b32.xlu0 %v2380_v55, %s2496_s23  ;;  %2255 = vmatmul.mubr.msk.f32.gmra.mxu0 %vm1527_vm11, %v1503_v2 }
 0x1d3   : > { %v990_v61 = vpop.permute.xlu1 %989 }
 0x1d4   : > { %v988_v56 = vpop.permute.xlu0 %987  ;;  %v1439_v32 = vsel %vm1423_vm8, %v1406_v9, %v990_v61 }
 0x1d5   : > { %812 = vrot.lane.b32.xlu1 %v4441_v49, %s2494_s7  ;;  %v1438_v30 = vsel %vm1423_vm8, %v1405_v27, %v988_v56  ;;  %v248_v56 = vld [vmem:[%s2582_s30 + $0x180] sm:$0xff]  ;;  %v756_v27 = vrot.slane %v249_v52, 1 }
 0x1d6   : > { %712 = vrot.lane.b32.xlu0 %v2380_v55, %s2493_s6  ;;  %v856_v42 = vrot.slane %v248_v56, 2 }
 0x1d7   : > { %v793_v60 = vpop.permute.xlu1 %792 }
 0x1d8   : > { %v1090_v12 = vpop.permute.xlu0 %1089  ;;  %v1374_v19 = vsel %vm1357_vm6, %v1341_v25, %v793_v60 }
 0x1d9   : > { %1210 = vrot.lane.b32.xlu1 %v4442_v11, %s2498_s8  ;;  %v1471_v51 = vsel %vm1456_vm9, %v1438_v30, %v1090_v12  ;;  %v755_v12 = vrot.slane %v248_v56, 1 }
 0x1da   : > { %1111 = vrot.lane.b32.xlu0 %v4443_v3, %s2497_s4 }
 0x1db   : > { %v1191_v35 = vpop.permute.xlu1 %1190 }
 0x1dc   : > { %v1504_v62 = vsel %vm1489_vm10, %v1471_v51, %v1191_v35  ;;  %v1092_v33 = vpop.permute.xlu0 %1091  ;;  %v1343_v51 = vsel %vm1324_vm5, %v3389_v0, %v3563_v50 }
 0x1dd   : > { %913 = vrot.lane.b32.xlu1 %v4442_v11, %s2495_s10  ;;  %2257 = vmatprep.mubr.msk.f32.mxu0 %vm1527_vm11, %v1504_v62  ;;  %v1472_v6 = vsel %vm1456_vm9, %v1439_v32, %v1092_v33 }
 0x1de   : > { %814 = vrot.lane.b32.xlu0 %v4443_v3, %s2494_s7  ;;  %v757_v3 = vsel %vm302_vm0, %v755_v12, %v756_v27 }
 0x1df   : > { %v894_v31 = vpop.permute.xlu1 %893 }
 0x1e0   : > { %v795_v45 = vpop.permute.xlu0 %794  ;;  %v1407_v29 = vsel %vm1390_vm7, %v1374_v19, %v894_v31  ;;  %v250_v31 = vld [vmem:[%s2582_s30 + $0x190] sm:$0x3] }
 0x1e1   : > { %915 = vrot.lane.b32.xlu1 %v4444_v54, %s2495_s10  ;;  %v1375_v2 = vsel %vm1357_vm6, %v1342_v44, %v795_v45 }
 0x1e2   : > { %1212 = vrot.lane.b32.xlu0 %v4444_v54, %s2498_s8  ;;  %v857_v54 = vrot.slane %v249_v52, 2 }
 0x1e3   : > { %v896_v16 = vpop.permute.xlu1 %895 }
 0x1e4   : > { %v1193_v34 = vpop.permute.xlu0 %1192  ;;  %v1408_v49 = vsel %vm1390_vm7, %v1375_v2, %v896_v16  ;;  %v758_v16 = vrot.slane %v250_v31, 1 }
 0x1e5   : > { %v1505_v1 = vsel %vm1489_vm10, %v1472_v6, %v1193_v34  ;;  %714 = vrot.lane.b32.xlu1 %v2381_v48, %s2493_s6  ;;  %v858_v6 = vsel %vm479_vm1, %v856_v42, %v857_v54 }
 0x1e6   : > { %1011 = vrot.lane.b32.xlu0 %v2381_v48, %s2496_s23  ;;  %2258 = vmatmul.mubr.msk.f32.gmra.mxu0 %vm1527_vm11, %v1505_v1  ;;  %v759_v1 = vsel %vm302_vm0, %v756_v27, %v758_v16  ;;  %v1344_v48 = vsel %vm1324_vm5, %v3386_v22, %v3561_v21 }
 0x1e7   : > { %v994_v40 = vpop.permute.xlu1 %993 }
 0x1e8   : > { %v992_v38 = vpop.permute.xlu0 %991  ;;  %v1441_v55 = vsel %vm1423_vm8, %v1408_v49, %v994_v40 }
 0x1e9   : > { %1113 = vrot.lane.b32.xlu1 %v4445_v28, %s2497_s4  ;;  %v1440_v7 = vsel %vm1423_vm8, %v1407_v29, %v992_v38 }
 0x1ea   : > { %1013 = vrot.lane.b32.xlu0 %v2382_v26, %s2496_s23 }
 0x1eb   : > { %v797_v13 = vpop.permute.xlu1 %796 }
 0x1ec   : > { %v1094_v8 = vpop.permute.xlu0 %1093  ;;  %v1376_v62 = vsel %vm1357_vm6, %v1343_v51, %v797_v13 }
 0x1ed   : > { %816 = vrot.lane.b32.xlu1 %v4445_v28, %s2494_s7  ;;  %v1473_v37 = vsel %vm1456_vm9, %v1440_v7, %v1094_v8  ;;  %v252_v7 = vld [vmem:[%s2582_s30 + $0x1a0] sm:$0xff] }
 0x1ee   : > { %716 = vrot.lane.b32.xlu0 %v2382_v26, %s2493_s6  ;;  %v859_v26 = vrot.slane %v250_v31, 2 }
 0x1ef   : > { %v1195_v59 = vpop.permute.xlu1 %1194 }
 0x1f0   : > { %v1096_v5 = vpop.permute.xlu0 %1095  ;;  %v1506_v20 = vsel %vm1489_vm10, %v1473_v37, %v1195_v59  ;;  %v860_v8 = vsel %vm479_vm1, %v857_v54, %v859_v26  ;;  %v253_v37 = vld [vmem:[%s2582_s30 + $0x1a8] sm:$0x3] }
 0x1f1   : > { %1214 = vrot.lane.b32.xlu1 %v4446_v57, %s2498_s8  ;;  %2260 = vmatprep.mubr.msk.f32.mxu1 %vm1527_vm11, %v1506_v20  ;;  %v1474_v60 = vsel %vm1456_vm9, %v1441_v55, %v1096_v5  ;;  %v251_v5 = vld [vmem:[%s2582_s30 + $0x198] sm:$0xff]  ;;  %v1057_v20 = vrot.slane %v252_v7, 1  ;;  %v1160_v49 = vrot.slane %v253_v37, 2  ;;  %v1345_v55 = vsel %vm1324_vm5, %v3405_v41, %v3571_v36 }
 0x1f2   : > { %1115 = vrot.lane.b32.xlu0 %v4447_v46, %s2497_s4 }
 0x1f3   : > { %v898_v53 = vpop.permute.xlu1 %897 }
 0x1f4   : > { %v799_v47 = vpop.permute.xlu0 %798  ;;  %v1409_v58 = vsel %vm1390_vm7, %v1376_v62, %v898_v53  ;;  %v1056_v53 = vrot.slane %v251_v5, 1 }
 0x1f5   : > { %917 = vrot.lane.b32.xlu1 %v4446_v57, %s2495_s10  ;;  %v1377_v38 = vsel %vm1357_vm6, %v1344_v48, %v799_v47  ;;  %v1059_v57 = vrot.slane %v253_v37, 1  ;;  %v1158_v47 = vrot.slane %v252_v7, 2 }
 0x1f6   : > { %818 = vrot.lane.b32.xlu0 %v4447_v46, %s2494_s7 }
 0x1f7   : > { %v900_v61 = vpop.permute.xlu1 %899  ;;  %v1060_v2 = vsel %vm302_vm0, %v1057_v20, %v1059_v57  ;;  %v1161_v27 = vsel %vm479_vm1, %v1158_v47, %v1160_v49 }
 0x1f8   : > { %v1197_v24 = vpop.permute.xlu0 %1196  ;;  %v1410_v28 = vsel %vm1390_vm7, %v1377_v38, %v900_v61  ;;  %v1157_v61 = vrot.slane %v251_v5, 2 }
 0x1f9   : > { %v1507_v43 = vsel %vm1489_vm10, %v1474_v60, %v1197_v24  ;;  %919 = vrot.lane.b32.xlu1 %v4448_v23, %s2495_s10 }
 0x1fa   : > { %1216 = vrot.lane.b32.xlu0 %v4448_v23, %s2498_s8  ;;  %2261 = vmatmul.mubr.msk.f32.vlgmr.msra.gmra.mxu1 %vm1527_vm11, %v1507_v43 }
 0x1fb   : > { %v998_v11 = vpop.permute.xlu1 %997 }
 0x1fc   : > { %v996_v30 = vpop.permute.xlu0 %995  ;;  %v1443_v25 = vsel %vm1423_vm8, %v1410_v28, %v998_v11  ;;  %v1159_v11 = vsel %vm479_vm1, %v1157_v61, %v1158_v47 }
 0x1fd   : > { %718 = vrot.lane.b32.xlu1 %v248_v56, %s2493_s6  ;;  %v1442_v45 = vsel %vm1423_vm8, %v1409_v58, %v996_v30 }
 0x1fe   : > { %1015 = vrot.lane.b32.xlu0 %v248_v56, %s2496_s23 }
 0x1ff   : > { %v801_v35 = vpop.permute.xlu1 %800 }
 0x200   : > { %v1098_v33 = vpop.permute.xlu0 %1097  ;;  %v1378_v60 = vsel %vm1357_vm6, %v1345_v55, %v801_v35 }
 0x201   : > { %1117 = vrot.lane.b32.xlu1 %v757_v3, %s2497_s4  ;;  %v1475_v9 = vsel %vm1456_vm9, %v1442_v45, %v1098_v33  ;;  %v1346_v45 = vsel %vm1324_vm5, %v3402_v14, %v3569_v39 }
 0x202   : > { %1017 = vrot.lane.b32.xlu0 %v249_v52, %s2496_s23 }
 0x203   : > { %v1199_v32 = vpop.permute.xlu1 %1198 }
 0x204   : > { %v1508_v0 = vsel %vm1489_vm10, %v1475_v9, %v1199_v32  ;;  %v1100_v50 = vpop.permute.xlu0 %1099 }
 0x205   : > { %820 = vrot.lane.b32.xlu1 %v757_v3, %s2494_s7  ;;  %2263 = vmatprep.mubr.msk.f32.mxu1 %vm1527_vm11, %v1508_v0  ;;  %v1476_v19 = vsel %vm1456_vm9, %v1443_v25, %v1100_v50 }
 0x206   : > { %720 = vrot.lane.b32.xlu0 %v249_v52, %s2493_s6  ;;  %s3991_s6 = sand.u32 1, %s2473_s13   ;;  %v1058_v52 = vsel %vm302_vm0, %v1056_v53, %v1057_v20 }
 0x207   : > { %v902_v34 = vpop.permute.xlu1 %901  ;;  %s1997_s21 = scalar_lea.sflag [#allocation3], %s3991_s6 }
 0x208   : > { %v3970_v40 = vpop.permute.xlu0 %802  ;;  %v1411_v43 = vsel %vm1390_vm7, %v1378_v60, %v902_v34 }
 0x209   : > { %1218 = vrot.lane.b32.xlu1 %v858_v6, %s2498_s8  ;;  %v1379_v54 = vsel %vm1357_vm6, %v1346_v45, %v3970_v40 }
 0x20a   : > { %1119 = vrot.lane.b32.xlu0 %v759_v1, %s2497_s4 }
 0x20b   : > { %v904_v13 = vpop.permute.xlu1 %903 }
 0x20c   : > { %v1201_v22 = vpop.permute.xlu0 %1200  ;;  %v1412_v9 = vsel %vm1390_vm7, %v1379_v54, %v904_v13 }
 0x20d   : > { %v1509_v21 = vsel %vm1489_vm10, %v1476_v19, %v1201_v22  ;;  %921 = vrot.lane.b32.xlu1 %v858_v6, %s2495_s10 }
 0x20e   : > { %822 = vrot.lane.b32.xlu0 %v759_v1, %s2494_s7  ;;  %2264 = vmatmul.mubr.msk.f32.gmra.mxu1 %vm1527_vm11, %v1509_v21  ;;  %s2145_s7 = sshll.u32 %s3991_s6, 8 }
 0x20f   : > { %v3983_v29 = vpop.permute.xlu1 %702  ;;  %s4008_s30 = scalar_lea.vmem [#allocation2], %s2145_s7 }
 0x210   : > { %v1000_v59 = vpop.permute.xlu0 %999  ;;  %v1347_v40 = vsel %vm1324_vm5, %v3421_v15, %v3983_v29 }
 0x211   : > { %923 = vrot.lane.b32.xlu1 %v860_v8, %s2495_s10  ;;  %v1444_v23 = vsel %vm1423_vm8, %v1411_v43, %v1000_v59  ;;  %s2018_s10 = sshll.u32 %s4008_s30, 4  ;;  %s4144_s10 = int_to_ptr.vmem [resolvable:$true] %s2018_s10 }
 0x212   : > { %1220 = vrot.lane.b32.xlu0 %v860_v8, %s2498_s8  ;;  %p2390_p1 = scmp.lt.s32.totalorder %s4144_s10, %s2388_s27 }
 0x213   : > { %v1102_v46 = vpop.permute.xlu1 %1101 }
 0x214   : > { %v1002_v44 = vpop.permute.xlu0 %1001  ;;  %v1477_v41 = vsel %vm1456_vm9, %v1444_v23, %v1102_v46 }
 0x215   : > { %1021 = vrot.lane.b32.xlu1 %v252_v7, %s2496_s23  ;;  %v1445_v32 = vsel %vm1423_vm8, %v1412_v9, %v1002_v44 }
 0x216   : > { %1019 = vrot.lane.b32.xlu0 %v251_v5, %s2496_s23  ;;  %s2383_s23 = scalar_lea.vmem %s4144_s10, 4096 }
 0x217   : > { %v805_v56 = vpop.permute.xlu1 %804  ;;  %p2384_p12 = scmp.ne.s32.totalorder %s4144_s10, %s2383_s23  ;;  %p2391_p2 = scmp.lt.s32.totalorder %s2389_s28, %s2383_s23 }
 0x218   : > { %v705_v24 = vpop.permute.xlu0 %704  ;;  %v1380_v28 = vsel %vm1357_vm6, %v1347_v40, %v805_v56 }
 0x219   : > { %1123 = vrot.lane.b32.xlu1 %v1060_v2, %s2497_s4  ;;  %v1348_v46 = vsel %vm1324_vm5, %v3418_v18, %v705_v24  ;;  %p2385_p13 = pnand %p2384_p12, %p2562_p4  ;;  %p2392_p3 = por %p2391_p2, %p2390_p1 }
 0x21a   : > { %v2238_v12 = vpop.f32.mrf.mxu0  ;;  %1121 = vrot.lane.b32.xlu0 %v1058_v52, %s2497_s4 }
 0x21b   : > { %1854 = vst [vmem:[%s4008_s30 + $0x8] sm:$0xff] %v2238_v12  ;;  %v1203_v36 = vpop.permute.xlu1 %1202  ;;  %v1923_v35 = vmul.f32 %v2238_v12, %v2238_v12  ;;  %p2386_p0 = pneg %p2385_p13 }
 0x21c   : > { %v1510_v30 = vsel %vm1489_vm10, %v1477_v41, %v1203_v36  ;;  %v1694_v3 = vpop.f32.mrf.mxu0  ;;  %v1104_v51 = vpop.permute.xlu0 %1103 }
 0x21d   : > { %1853 = vst [vmem:[%s4008_s30] sm:$0xff] %v1694_v3  ;;  %v1885_v62 = vadd.f32 %v2238_v12, %v1694_v3  ;;  %v1922_v33 = vmul.f32 %v1694_v3, %v1694_v3  ;;  %1224 = vrot.lane.b32.xlu1 %v1161_v27, %s2498_s8  ;;  %2266 = vmatprep.mubr.msk.f32.mxu1 %vm1527_vm11, %v1510_v30  ;;  %p2393_p5 = pnand %p2392_p3, %p2386_p0 }
 0x21e   : > { %1222 = vrot.lane.b32.xlu0 %v1159_v11, %s2498_s8  ;;  %v1478_v0 = vsel %vm1456_vm9, %v1445_v32, %v1104_v51 }
 0x21f   : > { %v1954_v31 = vadd.f32 %v1923_v35, %v1922_v33  ;;  %v906_v58 = vpop.permute.xlu1 %905 }
 0x220   : > { %v807_v42 = vpop.permute.xlu0 %806  ;;  %v1413_v13 = vsel %vm1390_vm7, %v1380_v28, %v906_v58 }
 0x221   : > { %v1381_v44 = vsel %vm1357_vm6, %v1348_v46, %v807_v42 }
 0x223   : > { %v908_v16 = vpop.permute.xlu1 %907 }
 0x224   : > { %v1205_v50 = vpop.permute.xlu0 %1204  ;;  %v1414_v47 = vsel %vm1390_vm7, %v1381_v44, %v908_v16 }
 0x225   : > { %v1511_v6 = vsel %vm1489_vm10, %v1478_v0, %v1205_v50 }
 0x226   : > { %2267 = vmatmul.mubr.msk.f32.gmra.mxu1 %vm1527_vm11, %v1511_v6 }
 0x227   : > { %v707_v34 = vpop.permute.xlu1 %706 }
 0x228   : > { %v1004_v14 = vpop.permute.xlu0 %1003  ;;  %v1349_v41 = vsel %vm1324_vm5, %v3437_v10, %v707_v34 }
 0x229   : > { %v1446_v21 = vsel %vm1423_vm8, %v1413_v13, %v1004_v14 }
 0x22b   : > { %v1106_v39 = vpop.permute.xlu1 %1105 }
 0x22c   : > { %v1006_v1 = vpop.permute.xlu0 %1005  ;;  %v1479_v8 = vsel %vm1456_vm9, %v1446_v21, %v1106_v39 }
 0x22d   : > { %v1447_v2 = vsel %vm1423_vm8, %v1414_v47, %v1006_v1 }
 0x22e   : > { %v2241_v48 = vpop.f32.mrf.mxu0 }
 0x22f   : > { %1856 = vst [vmem:[%s4008_s30 + $0x18] sm:$0xff] %v2241_v48  ;;  %v809_v38 = vpop.permute.xlu1 %808  ;;  %v1925_v7 = vmul.f32 %v2241_v48, %v2241_v48 }
 0x230   : > { %v1704_v26 = vpop.f32.mrf.mxu0  ;;  %v709_v25 = vpop.permute.xlu0 %708  ;;  %v1382_v51 = vsel %vm1357_vm6, %v1349_v41, %v809_v38 }
 0x231   : > { %1855 = vst [vmem:[%s4008_s30 + $0x10] sm:$0xff] %v1704_v26  ;;  %v1886_v19 = vadd.f32 %v1885_v62, %v1704_v26  ;;  %v1924_v22 = vmul.f32 %v1704_v26, %v1704_v26  ;;  %v1350_v9 = vsel %vm1324_vm5, %v3434_v63, %v709_v25 }
 0x233   : > { %v1955_v37 = vadd.f32 %v1954_v31, %v1924_v22  ;;  %v1207_v59 = vpop.permute.xlu1 %1206  ;;  %v1887_v5 = vadd.f32 %v2241_v48, %v1886_v19 }
 0x234   : > { %v1512_v15 = vsel %vm1489_vm10, %v1479_v8, %v1207_v59  ;;  %v1108_v29 = vpop.permute.xlu0 %1107 }
 0x235   : > { %2269 = vmatprep.mubr.msk.f32.mxu1 %vm1527_vm11, %v1512_v15  ;;  %v1956_v20 = vadd.f32 %v1955_v37, %v1925_v7  ;;  %v1480_v55 = vsel %vm1456_vm9, %v1447_v2, %v1108_v29 }
 0x237   : > { %v910_v57 = vpop.permute.xlu1 %909 }
 0x238   : > { %v811_v53 = vpop.permute.xlu0 %810  ;;  %v1415_v62 = vsel %vm1390_vm7, %v1382_v51, %v910_v57 }
 0x239   : > { %v1383_v16 = vsel %vm1357_vm6, %v1350_v9, %v811_v53 }
 0x23b   : > { %v912_v49 = vpop.permute.xlu1 %911 }
 0x23c   : > { %v1209_v61 = vpop.permute.xlu0 %1208  ;;  %v1416_v0 = vsel %vm1390_vm7, %v1383_v16, %v912_v49  ;;  %v4450_v16 = vld [vmem:[#allocation8_spill] sm:$0xff] }
 0x23d   : > { %v1513_v56 = vsel %vm1489_vm10, %v1480_v55, %v1209_v61 }
 0x23e   : > { %2270 = vmatmul.mubr.msk.f32.gmra.mxu1 %vm1527_vm11, %v1513_v56 }
 0x23f   : > { %v711_v52 = vpop.permute.xlu1 %710 }
 0x240   : > { %v1008_v60 = vpop.permute.xlu0 %1007  ;;  %v1351_v8 = vsel %vm1324_vm5, %v3453_v17, %v711_v52 }
 0x241   : > { %v1448_v31 = vsel %vm1423_vm8, %v1415_v62, %v1008_v60 }
 0x242   : > { %v2244_v43 = vpop.f32.mrf.mxu0 }
 0x243   : > { %1858 = vst [vmem:[%s4008_s30 + $0x28] sm:$0xff] %v2244_v43  ;;  %v1110_v18 = vpop.permute.xlu1 %1109  ;;  %v1927_v36 = vmul.f32 %v2244_v43, %v2244_v43 }
 0x244   : > { %v1714_v24 = vpop.f32.mrf.mxu0  ;;  %v1010_v23 = vpop.permute.xlu0 %1009  ;;  %v1481_v58 = vsel %vm1456_vm9, %v1448_v31, %v1110_v18 }
 0x245   : > { %1857 = vst [vmem:[%s4008_s30 + $0x20] sm:$0xff] %v1714_v24  ;;  %v1888_v12 = vadd.f32 %v1887_v5, %v1714_v24  ;;  %v1926_v27 = vmul.f32 %v1714_v24, %v1714_v24  ;;  %v1449_v50 = vsel %vm1423_vm8, %v1416_v0, %v1010_v23 }
 0x247   : > { %v1957_v11 = vadd.f32 %v1956_v20, %v1926_v27  ;;  %v813_v30 = vpop.permute.xlu1 %812  ;;  %v1889_v3 = vadd.f32 %v2244_v43, %v1888_v12 }
 0x248   : > { %v713_v35 = vpop.permute.xlu0 %712  ;;  %v1384_v37 = vsel %vm1357_vm6, %v1351_v8, %v813_v30  ;;  %v4451_v8 = vld [vmem:[#allocation9_spill] sm:$0xff] }
 0x249   : > { %v1958_v33 = vadd.f32 %v1957_v11, %v1927_v36  ;;  %v1352_v17 = vsel %vm1324_vm5, %v3450_v4, %v713_v35 }
 0x24b   : > { %v1211_v45 = vpop.permute.xlu1 %1210 }
 0x24c   : > { %v1514_v42 = vsel %vm1489_vm10, %v1481_v58, %v1211_v45  ;;  %v1112_v54 = vpop.permute.xlu0 %1111 }
 0x24d   : > { %2272 = vmatprep.mubr.msk.f32.mxu1 %vm1527_vm11, %v1514_v42  ;;  %v1482_v34 = vsel %vm1456_vm9, %v1449_v50, %v1112_v54 }
 0x24f   : > { %v914_v10 = vpop.permute.xlu1 %913 }
 0x250   : > { %v815_v32 = vpop.permute.xlu0 %814  ;;  %v1417_v5 = vsel %vm1390_vm7, %v1384_v37, %v914_v10 }
 0x251   : > { %v1385_v47 = vsel %vm1357_vm6, %v1352_v17, %v815_v32 }
 0x253   : > { %v916_v6 = vpop.permute.xlu1 %915 }
 0x254   : > { %v1213_v14 = vpop.permute.xlu0 %1212  ;;  %v1418_v2 = vsel %vm1390_vm7, %v1385_v47, %v916_v6 }
 0x255   : > { %v1515_v39 = vsel %vm1489_vm10, %v1482_v34, %v1213_v14 }
 0x256   : > { %v2247_v1 = vpop.f32.mrf.mxu0  ;;  %2273 = vmatmul.mubr.msk.f32.gmra.mxu1 %vm1527_vm11, %v1515_v39 }
 0x257   : > { %1860 = vst [vmem:[%s4008_s30 + $0x38] sm:$0xff] %v2247_v1  ;;  %v715_v48 = vpop.permute.xlu1 %714  ;;  %v1929_v26 = vmul.f32 %v2247_v1, %v2247_v1 }
 0x258   : > { %v1724_v40 = vpop.f32.mrf.mxu0  ;;  %v1012_v63 = vpop.permute.xlu0 %1011 }
 0x259   : > { %1859 = vst [vmem:[%s4008_s30 + $0x30] sm:$0xff] %v1724_v40  ;;  %v1890_v38 = vadd.f32 %v1889_v3, %v1724_v40  ;;  %v1928_v28 = vmul.f32 %v1724_v40, %v1724_v40  ;;  %v1450_v15 = vsel %vm1423_vm8, %v1417_v5, %v1012_v63  ;;  %v4449_v3 = vld [vmem:[#allocation10_spill] sm:$0xff] }
 0x25a   : > { %v1353_v51 = vsel %vm1324_vm5, %v4449_v3, %v715_v48 }
 0x25b   : > { %v1959_v25 = vadd.f32 %v1958_v33, %v1928_v28  ;;  %v1114_v13 = vpop.permute.xlu1 %1113  ;;  %v1891_v19 = vadd.f32 %v2247_v1, %v1890_v38 }
 0x25c   : > { %v1014_v22 = vpop.permute.xlu0 %1013  ;;  %v1483_v29 = vsel %vm1456_vm9, %v1450_v15, %v1114_v13 }
 0x25d   : > { %v1960_v21 = vadd.f32 %v1959_v25, %v1929_v26  ;;  %v1451_v55 = vsel %vm1423_vm8, %v1418_v2, %v1014_v22 }
 0x25f   : > { %v817_v7 = vpop.permute.xlu1 %816 }
 0x260   : > { %v717_v59 = vpop.permute.xlu0 %716  ;;  %v1386_v62 = vsel %vm1357_vm6, %v1353_v51, %v817_v7 }
 0x261   : > { %v1354_v0 = vsel %vm1324_vm5, %v4450_v16, %v717_v59  ;;  %v4452_v59 = vld [vmem:[#allocation35_spill] sm:$0xff] }
 0x263   : > { %v1215_v20 = vpop.permute.xlu1 %1214 }
 0x264   : > { %v1516_v57 = vsel %vm1489_vm10, %v1483_v29, %v1215_v20  ;;  %v1116_v46 = vpop.permute.xlu0 %1115 }
 0x265   : > { %2275 = vmatprep.mubr.msk.f32.mxu1 %vm1527_vm11, %v1516_v57  ;;  %v1484_v56 = vsel %vm1456_vm9, %v1451_v55, %v1116_v46 }
 0x267   : > { %v918_v53 = vpop.permute.xlu1 %917 }
 0x268   : > { %v819_v44 = vpop.permute.xlu0 %818  ;;  %v1419_v31 = vsel %vm1390_vm7, %v1386_v62, %v918_v53 }
 0x269   : > { %v1387_v34 = vsel %vm1357_vm6, %v1354_v0, %v819_v44 }
 0x26a   : > { %v2250_v49 = vpop.f32.mrf.mxu0 }
 0x26b   : > { %1862 = vst [vmem:[%s4008_s30 + $0x48] sm:$0xff] %v2250_v49  ;;  %v920_v61 = vpop.permute.xlu1 %919  ;;  %v1931_v4 = vmul.f32 %v2250_v49, %v2250_v49 }
 0x26c   : > { %v1734_v52 = vpop.f32.mrf.mxu0  ;;  %v1217_v60 = vpop.permute.xlu0 %1216  ;;  %v1420_v1 = vsel %vm1390_vm7, %v1387_v34, %v920_v61 }
 0x26d   : > { %1861 = vst [vmem:[%s4008_s30 + $0x40] sm:$0xff] %v1734_v52  ;;  %v1892_v43 = vadd.f32 %v1891_v19, %v1734_v52  ;;  %v1930_v18 = vmul.f32 %v1734_v52, %v1734_v52  ;;  %v1517_v24 = vsel %vm1489_vm10, %v1484_v56, %v1217_v60 }
 0x26e   : > { %2276 = vmatmul.mubr.msk.f32.gmra.mxu1 %vm1527_vm11, %v1517_v24 }
 0x26f   : > { %v1961_v23 = vadd.f32 %v1960_v21, %v1930_v18  ;;  %v719_v12 = vpop.permute.xlu1 %718  ;;  %v1893_v27 = vadd.f32 %v2250_v49, %v1892_v43 }
 0x270   : > { %v1016_v41 = vpop.permute.xlu0 %1015  ;;  %v1355_v5 = vsel %vm1324_vm5, %v4452_v59, %v719_v12 }
 0x271   : > { %v1962_v36 = vadd.f32 %v1961_v23, %v1931_v4  ;;  %v1452_v58 = vsel %vm1423_vm8, %v1419_v31, %v1016_v41 }
 0x273   : > { %v1118_v11 = vpop.permute.xlu1 %1117 }
 0x274   : > { %v1018_v30 = vpop.permute.xlu0 %1017  ;;  %v1485_v45 = vsel %vm1456_vm9, %v1452_v58, %v1118_v11 }
 0x275   : > { %v1453_v48 = vsel %vm1423_vm8, %v1420_v1, %v1018_v30 }
 0x277   : > { %v821_v35 = vpop.permute.xlu1 %820 }
 0x278   : > { %v721_v33 = vpop.permute.xlu0 %720  ;;  %v1388_v20 = vsel %vm1357_vm6, %v1355_v5, %v821_v35 }
 0x279   : > { %v1356_v7 = vsel %vm1324_vm5, %v4451_v8, %v721_v33 }
 0x27b   : > { %v1219_v42 = vpop.permute.xlu1 %1218 }
 0x27c   : > { %v1518_v54 = vsel %vm1489_vm10, %v1485_v45, %v1219_v42  ;;  %v1120_v10 = vpop.permute.xlu0 %1119 }
 0x27d   : > { %2278 = vmatprep.mubr.msk.f32.mxu1 %vm1527_vm11, %v1518_v54  ;;  %v1486_v26 = vsel %vm1456_vm9, %v1453_v48, %v1120_v10 }
 0x27e   : > { %v2253_v9 = vpop.f32.mrf.mxu0 }
 0x27f   : > { %1864 = vst [vmem:[%s4008_s30 + $0x58] sm:$0xff] %v2253_v9  ;;  %v922_v32 = vpop.permute.xlu1 %921  ;;  %v1933_v40 = vmul.f32 %v2253_v9, %v2253_v9 }
 0x280   : > { %v1744_v50 = vpop.f32.mrf.mxu0  ;;  %v823_v6 = vpop.permute.xlu0 %822  ;;  %v1421_v46 = vsel %vm1390_vm7, %v1388_v20, %v922_v32 }
 0x281   : > { %1863 = vst [vmem:[%s4008_s30 + $0x50] sm:$0xff] %v1744_v50  ;;  %v1894_v14 = vadd.f32 %v1893_v27, %v1744_v50  ;;  %v1932_v39 = vmul.f32 %v1744_v50, %v1744_v50  ;;  %v1389_v15 = vsel %vm1357_vm6, %v1356_v7, %v823_v6 }
 0x283   : > { %v1963_v63 = vadd.f32 %v1962_v36, %v1932_v39  ;;  %v924_v38 = vpop.permute.xlu1 %923  ;;  %v1895_v28 = vadd.f32 %v2253_v9, %v1894_v14 }
 0x284   : > { %v1221_v25 = vpop.permute.xlu0 %1220  ;;  %v1422_v57 = vsel %vm1390_vm7, %v1389_v15, %v924_v38 }
 0x285   : > { %v1519_v13 = vsel %vm1489_vm10, %v1486_v26, %v1221_v25  ;;  %v1964_v19 = vadd.f32 %v1963_v63, %v1933_v40 }
 0x286   : > { %2279 = vmatmul.mubr.msk.f32.gmra.mxu1 %vm1527_vm11, %v1519_v13 }
 0x287   : > { %v1022_v22 = vpop.permute.xlu1 %1021 }
 0x288   : > { %v1020_v21 = vpop.permute.xlu0 %1019  ;;  %v1455_v53 = vsel %vm1423_vm8, %v1422_v57, %v1022_v22 }
 0x289   : > { %v1454_v17 = vsel %vm1423_vm8, %v1421_v46, %v1020_v21 }
 0x28b   : > { %v1124_v37 = vpop.permute.xlu1 %1123 }
 0x28c   : > { %v1122_v29 = vpop.permute.xlu0 %1121  ;;  %v1488_v44 = vsel %vm1456_vm9, %v1455_v53, %v1124_v37 }
 0x28d   : > { %v1487_v2 = vsel %vm1456_vm9, %v1454_v17, %v1122_v29 }
 0x28f   : > { %v1225_v47 = vpop.permute.xlu1 %1224 }
 0x290   : > { %v1521_v49 = vsel %vm1489_vm10, %v1488_v44, %v1225_v47  ;;  %v1223_v55 = vpop.permute.xlu0 %1222 }
 0x291   : > { %v1520_v61 = vsel %vm1489_vm10, %v1487_v2, %v1223_v55 }
 0x292   : > { %v2256_v56 = vpop.f32.mrf.mxu0  ;;  %2281 = vmatprep.mubr.msk.f32.mxu1 %vm1527_vm11, %v1520_v61 }
 0x293   : > { %1866 = vst [vmem:[%s4008_s30 + $0x68] sm:$0xff] %v2256_v56  ;;  %2282 = vmatmul.mubr.msk.f32.gmra.mxu1 %vm1527_vm11, %v1521_v49  ;;  %v1935_v18 = vmul.f32 %v2256_v56, %v2256_v56 }
 0x294   : > { %v1754_v52 = vpop.f32.mrf.mxu0 }
 0x295   : > { %1865 = vst [vmem:[%s4008_s30 + $0x60] sm:$0xff] %v1754_v52  ;;  %v1896_v60 = vadd.f32 %v1895_v28, %v1754_v52  ;;  %v1934_v43 = vmul.f32 %v1754_v52, %v1754_v52 }
 0x297   : > { %v1965_v24 = vadd.f32 %v1964_v19, %v1934_v43  ;;  %v1897_v4 = vadd.f32 %v2256_v56, %v1896_v60 }
 0x299   : > { %v1966_v23 = vadd.f32 %v1965_v24, %v1935_v18 }
 0x2a6   : > { %v2259_v12 = vpop.f32.mrf.mxu0 }
 0x2a7   : > { %1868 = vst [vmem:[%s4008_s30 + $0x78] sm:$0xff] %v2259_v12  ;;  %v1937_v11 = vmul.f32 %v2259_v12, %v2259_v12 }
 0x2a8   : > { %v1764_v27 = vpop.f32.mrf.mxu0 }
 0x2a9   : > { %1867 = vst [vmem:[%s4008_s30 + $0x70] sm:$0xff] %v1764_v27  ;;  %v1898_v41 = vadd.f32 %v1897_v4, %v1764_v27  ;;  %v1936_v36 = vmul.f32 %v1764_v27, %v1764_v27 }
 0x2ab   : > { %v1899_v30 = vadd.f32 %v2259_v12, %v1898_v41  ;;  %v1967_v3 = vadd.f32 %v1966_v23, %v1936_v36 }
 0x2ad   : > { %v1968_v51 = vadd.f32 %v1967_v3, %v1937_v11 }
 0x2ba   : > { %v2262_v35 = vpop.f32.mrf.mxu1 }
 0x2bb   : > { %1870 = vst [vmem:[%s4008_s30 + $0x88] sm:$0xff] %v2262_v35  ;;  %v1939_v58 = vmul.f32 %v2262_v35, %v2262_v35 }
 0x2bc   : > { %v1774_v62 = vpop.f32.mrf.mxu1 }
 0x2bd   : > { %1869 = vst [vmem:[%s4008_s30 + $0x80] sm:$0xff] %v1774_v62  ;;  %v1900_v33 = vadd.f32 %v1899_v30, %v1774_v62  ;;  %v1938_v31 = vmul.f32 %v1774_v62, %v1774_v62 }
 0x2bf   : > { %v1969_v45 = vadd.f32 %v1968_v51, %v1938_v31  ;;  %v1901_v42 = vadd.f32 %v2262_v35, %v1900_v33 }
 0x2c1   : > { %v1970_v54 = vadd.f32 %v1969_v45, %v1939_v58 }
 0x2ce   : > { %v2265_v10 = vpop.f32.mrf.mxu1 }
 0x2cf   : > { %1872 = vst [vmem:[%s4008_s30 + $0x98] sm:$0xff] %v2265_v10  ;;  %v1941_v0 = vmul.f32 %v2265_v10, %v2265_v10 }
 0x2d0   : > { %v1784_v9 = vpop.f32.mrf.mxu1 }
 0x2d1   : > { %1871 = vst [vmem:[%s4008_s30 + $0x90] sm:$0xff] %v1784_v9  ;;  %v1902_v32 = vadd.f32 %v1901_v42, %v1784_v9  ;;  %v1940_v16 = vmul.f32 %v1784_v9, %v1784_v9 }
 0x2d3   : > { %v1971_v50 = vadd.f32 %v1970_v54, %v1940_v16  ;;  %v1903_v6 = vadd.f32 %v2265_v10, %v1902_v32 }
 0x2d5   : > { %v1972_v34 = vadd.f32 %v1971_v50, %v1941_v0 }
 0x2e6   : > { %v2268_v14 = vpop.f32.mrf.mxu1 }
 0x2e7   : > { %1874 = vst [vmem:[%s4008_s30 + $0xa8] sm:$0xff] %v2268_v14  ;;  %v1943_v40 = vmul.f32 %v2268_v14, %v2268_v14 }
 0x2e8   : > { %v1794_v39 = vpop.f32.mrf.mxu1 }
 0x2e9   : > { %1873 = vst [vmem:[%s4008_s30 + $0xa0] sm:$0xff] %v1794_v39  ;;  %v1904_v1 = vadd.f32 %v1903_v6, %v1794_v39  ;;  %v1942_v48 = vmul.f32 %v1794_v39, %v1794_v39 }
 0x2eb   : > { %v1973_v63 = vadd.f32 %v1972_v34, %v1942_v48  ;;  %v1905_v38 = vadd.f32 %v2268_v14, %v1904_v1 }
 0x2ed   : > { %v1974_v28 = vadd.f32 %v1973_v63, %v1943_v40 }
 0x2fe   : > { %v2271_v26 = vpop.f32.mrf.mxu1 }
 0x2ff   : > { %1876 = vst [vmem:[%s4008_s30 + $0xb8] sm:$0xff] %v2271_v26  ;;  %v1945_v22 = vmul.f32 %v2271_v26, %v2271_v26 }
 0x300   : > { %v1804_v25 = vpop.f32.mrf.mxu1 }
 0x301   : > { %1875 = vst [vmem:[%s4008_s30 + $0xb0] sm:$0xff] %v1804_v25  ;;  %v1906_v13 = vadd.f32 %v1905_v38, %v1804_v25  ;;  %v1944_v19 = vmul.f32 %v1804_v25, %v1804_v25 }
 0x303   : > { %v1975_v21 = vadd.f32 %v1974_v28, %v1944_v19  ;;  %v1907_v8 = vadd.f32 %v2271_v26, %v1906_v13 }
 0x305   : > { %v1976_v7 = vadd.f32 %v1975_v21, %v1945_v22 }
 0x316   : > { %v2274_v37 = vpop.f32.mrf.mxu1 }
 0x317   : > { %1878 = vst [vmem:[%s4008_s30 + $0xc8] sm:$0xff] %v2274_v37  ;;  %v1947_v53 = vmul.f32 %v2274_v37, %v2274_v37 }
 0x318   : > { %v1814_v59 = vpop.f32.mrf.mxu1 }
 0x319   : > { %1877 = vst [vmem:[%s4008_s30 + $0xc0] sm:$0xff] %v1814_v59  ;;  %v1946_v29 = vmul.f32 %v1814_v59, %v1814_v59  ;;  %v1908_v20 = vadd.f32 %v1907_v8, %v1814_v59 }
 0x31b   : > { %v1977_v57 = vadd.f32 %v1976_v7, %v1946_v29  ;;  %v1909_v17 = vadd.f32 %v2274_v37, %v1908_v20 }
 0x31d   : > { %v1978_v49 = vadd.f32 %v1977_v57, %v1947_v53 }
 0x32e   : > { %v2277_v5 = vpop.f32.mrf.mxu1 }
 0x32f   : > { %1880 = vst [vmem:[%s4008_s30 + $0xd8] sm:$0xff] %v2277_v5  ;;  %v1949_v61 = vmul.f32 %v2277_v5, %v2277_v5 }
 0x330   : > { %v1824_v15 = vpop.f32.mrf.mxu1 }
 0x331   : > { %1879 = vst [vmem:[%s4008_s30 + $0xd0] sm:$0xff] %v1824_v15  ;;  %v1948_v44 = vmul.f32 %v1824_v15, %v1824_v15  ;;  %v1910_v2 = vadd.f32 %v1909_v17, %v1824_v15 }
 0x333   : > { %v1979_v55 = vadd.f32 %v1978_v49, %v1948_v44  ;;  %v1911_v56 = vadd.f32 %v2277_v5, %v1910_v2 }
 0x335   : > { %v1980_v43 = vadd.f32 %v1979_v55, %v1949_v61 }
 0x346   : > { %v2280_v46 = vpop.f32.mrf.mxu1 }
 0x347   : > { %1882 = vst [vmem:[%s4008_s30 + $0xe8] sm:$0xff] %v2280_v46  ;;  %v1951_v4 = vmul.f32 %v2280_v46, %v2280_v46 }
 0x348   : > { %v1834_v47 = vpop.f32.mrf.mxu1 }
 0x349   : > { %1881 = vst [vmem:[%s4008_s30 + $0xe0] sm:$0xff] %v1834_v47  ;;  %v1950_v52 = vmul.f32 %v1834_v47, %v1834_v47  ;;  %v1912_v60 = vadd.f32 %v1911_v56, %v1834_v47 }
 0x34b   : > { %v1981_v18 = vadd.f32 %v1980_v43, %v1950_v52  ;;  %v1913_v23 = vadd.f32 %v2280_v46, %v1912_v60 }
 0x34d   : > { %v1982_v36 = vadd.f32 %v1981_v18, %v1951_v4 }
 0x353   : > { %v2283_v24 = vpop.f32.mrf.mxu1 }
 0x354   : > { %1884 = vst [vmem:[%s4008_s30 + $0xf8] sm:$0xff] %v2283_v24 }
 0x355   : > { %v1844_v12 = vpop.f32.mrf.mxu1 }
 0x356   : > { %1883 = vst [vmem:[%s4008_s30 + $0xf0] sm:$0xff] %v1844_v12  ;;  %v1914_v27 = vadd.f32 %v1913_v23, %v1844_v12  ;;  %v1952_v41 = vmul.f32 %v1844_v12, %v1844_v12 }
 0x357   : > { %2396 = shalt.err (!%p2393_p5)
}
 0x358   : > { %s2397_s29 = scalar_lea.hbm %s4141_s19, 4096  ;;  %s2401_s7 = scalar_lea.hbm %s4219_s2, 8192 }
 0x359   : > { %p2398_p6 = scmp.ne.s32.totalorder %s4141_s19, %s2397_s29  ;;  %p2402_p10 = scmp.lt.s32.totalorder %s4141_s19, %s4219_s2 }
 0x35a   : > { %p2403_p11 = scmp.lt.s32.totalorder %s2401_s7, %s2397_s29 }
 0x35b   : > { %p2399_p7 = pnand %p2398_p6, %p2562_p4 }
 0x35c   : > { %p2404_p12 = por %p2403_p11, %p2402_p10 }
 0x35d   : > { %p2400_p9 = pneg %p2399_p7 }
 0x35f   : > { %p2405_p13 = pnand %p2404_p12, %p2400_p9 }
 0x361   : > { %2408 = shalt.err (!%p2405_p13)
}
 0x362   : > { %s2500_s11 = smov 128   ;;  %v1953_v11 = vmul.f32 %v2283_v24, %v2283_v24  ;;  %v1915_v30 = vadd.f32 %v2283_v24, %v1914_v27  ;;  %v1983_v3 = vadd.f32 %v1982_v36, %v1952_v41  ;;  %s2146_s18 = sshll.u32 %s3991_s6, 3  ;;  %vm1991_vm12 = vcmask 1040384  }
 0x363   : > { %2295 = dma.vmem_to_hbm [thread:$0]  (%p2562_p4), %s4144_s10, 4096, %s4141_s19, %s1997_s21, %s2500_s11, %s2500_s11, %s2492_s5   ;;  %vm1993_vm13 = vcmask 1041408  }
 0x364   : > { %v1916_v51 = vrot.slane %v1915_v30, 4  ;;  %v1984_v35 = vadd.f32 %v1983_v3, %v1953_v11  ;;  %s2185_s5 = sshll.u32 %s2481_s15, 7  ;;  %s190_s10 = scalar_lea.vmem [#allocation4], %s2146_s18 }
 0x365   : > { %s2035_s19 = sshll.u32 %s190_s10, 4  ;;  %s4176_s26 = scalar_lea.hbm %s4220_s3, %s2185_s5  ;;  %s2036_s19 = int_to_ptr.vmem [resolvable:$true] %s2035_s19 }
 0x366   : > { %v1917_v62 = vadd.f32 %v1916_v51, %v1915_v30  ;;  %v1985_v33 = vrot.slane %v1984_v35, 4  ;;  %s2002_s27 = scalar_lea.sflag [#allocation5], %s3991_s6  ;;  %s2409_s28 = scalar_lea.vmem %s2036_s19, 128 }
 0x367   : > { %p2410_p0 = scmp.ne.s32.totalorder %s2036_s19, %s2409_s28  ;;  %s2501_s15 = smov [#allocation4]  }
 0x368   : > { %v1918_v31 = vrot.slane %v1917_v62, 2  ;;  %v1986_v58 = vadd.f32 %v1985_v33, %v1984_v35  ;;  %s2413_s29 = sshll.u32 %s2501_s15, 4  ;;  %s2414_s29 = int_to_ptr.vmem [resolvable:$false] %s2413_s29 }
 0x369   : > { %p2411_p1 = pnand %p2410_p0, %p2562_p4  ;;  %s2415_s4 = scalar_lea.vmem %s2414_s29, 256 }
 0x36a   : > { %v1919_v45 = vadd.f32 %v1918_v31, %v1917_v62  ;;  %v1987_v42 = vrot.slane %v1986_v58, 2  ;;  %p2416_p3 = scmp.lt.s32.totalorder %s2036_s19, %s2414_s29  ;;  %p2417_p5 = scmp.lt.s32.totalorder %s2415_s4, %s2409_s28 }
 0x36b   : > { %p2412_p2 = pneg %p2411_p1 }
 0x36c   : > { %v1920_v54 = vrot.slane %v1919_v45, 1  ;;  %v1988_v10 = vadd.f32 %v1987_v42, %v1986_v58  ;;  %p2418_p6 = por %p2417_p5, %p2416_p3 }
 0x36e   : > { %v1989_v9 = vrot.slane %v1988_v10, 1  ;;  %v1921_v32 = vadd.f32 %v1920_v54, %v1919_v45  ;;  %p2419_p7 = pnand %p2418_p6, %p2412_p2 }
 0x370   : > { %v1990_v16 = vadd.f32 %v1989_v9, %v1988_v10 }
 0x372   : > { %v1992_v0 = vsel %vm1991_vm12, %v1921_v32, %v1990_v16 }
 0x373   : > { %v1994_v50 = vsel %vm1993_vm13, %v1992_v0, 0.0 }
 0x374   : > { %1995 = vst [vmem:[%s190_s10] sm:$0xff] %v1994_v50 }
 0x375   : > { %2422 = shalt.err (!%p2419_p7)
}
 0x376   : > { %s2423_s8 = scalar_lea.hbm %s4176_s26, 128  ;;  %s2427_s30 = scalar_lea.hbm %s4220_s3, 256 }
 0x377   : > { %p2424_p9 = scmp.ne.s32.totalorder %s4176_s26, %s2423_s8  ;;  %p2428_p12 = scmp.lt.s32.totalorder %s4176_s26, %s4220_s3 }
 0x378   : > { %p2429_p13 = scmp.lt.s32.totalorder %s2427_s30, %s2423_s8 }
 0x379   : > { %p2425_p10 = pnand %p2424_p9, %p2562_p4 }
 0x37a   : > { %p2430_p0 = por %p2429_p13, %p2428_p12 }
 0x37b   : > { %p2426_p11 = pneg %p2425_p10 }
 0x37d   : > { %p2431_p1 = pnand %p2430_p0, %p2426_p11 }
 0x37f   : > { %2434 = shalt.err (!%p2431_p1)
}
 0x380   : > { %2296 = dma.vmem_to_hbm [thread:$0]  (%p2562_p4), %s2036_s19, 128, %s4176_s26, %s2002_s27  }
 0x381 PF: > { %p2306_p2 = scmp.ge.s32.totalorder %s2489_s17, 2  ;;  %s2047_s18 = sand.u32 1, %s2469_s12  }
 0x382   : > { %s2048_s5 = scalar_lea.sflag [#allocation3], %s2047_s18 }
 0x383   : > { %p2300_p3 = pnand %p2306_p2, %p2569_p8 }
 0x385   : > { %p2301_p5 = pneg %p2300_p3 }
 0x387   : > { %2460 = dma.done.wait (%p2301_p5), %s2048_s5, 4096  }
 0x388   : > { %2462 = vsyncadd (%p2301_p5), %s2048_s5, 4294963200  ;;  %s2057_s10 = scalar_lea.sflag [#allocation5], %s2047_s18 }
 0x389   : > { %2464 = dma.done.wait (%p2301_p5), %s2057_s10, 128  }
 0x38a   : > { %2466 = vsyncadd (%p2301_p5), %s2057_s10, 4294967168  ;;  %s20_s17 = sadd.s32 1, %s2489_s17   ;;  %s4453_s12 = smov %s2473_s13 }
 0x38b   : > { %p17_p6 = scmp.ge.s32.totalorder %s20_s17, 4   ;;  %s4454_s13 = smov %s2477_s14 }
 0x38c   : > { %s4455_s14 = smov %s2575_s25  ;;  %s4456_s15 = smov %s2485_s16 }
 0x38d   : > { %s4457_s16 = smov %s4459_s20  ;;  %19 = sbr.rel (!%p17_p6) target bundleno = 6 (0x6), region = 81 }
 0x392   :  { %2062 = vsyncpa [#allocation3], 1 }
 0x393   :  { %2064 = vsyncpa [#allocation3 + $0x1], 1 }
 0x394   :  { %2065 = vsyncpa [#allocation5], 1 }
 0x395   :  { %2067 = vsyncpa [#allocation5 + $0x1], 1 }

</bundles_post_ra>
